<compile_context>
chip_gen: v7x
topology: tpu7x:2x2x1
jax: 0.10.0
libtpu: 0.0.40
codegen_flags: <defaults>
</compile_context>

<pallas_src>
import jax
import jax.numpy as jnp
from jax.experimental import pallas as pl
from jax.experimental.pallas import tpu as pltpu


IN_FEATURES = 784
K_PAD = 896  # 784 rounded up to a multiple of 128 (lane-aligned contraction)


def _round_up(n, m):
    return (n + m - 1) // m * m


def mlp_kernel(x_ref, w1_ref, b1_ref, w2_ref, b2_ref,
               w3_ref, b3_ref, w4_ref, b4_ref, o_ref):
    # x tile and all weights are bf16 -> native bf16xbf16 MXU path,
    # f32 accumulation via preferred_element_type. Biases are f32.
    x = x_ref[...]                                                  # (tb, 896) bf16

    # fc1 + ReLU : (tb, 896) @ (896, 512) + (1, 512)
    h1 = jnp.dot(x, w1_ref[...], preferred_element_type=jnp.float32) + b1_ref[...]
    h1 = jnp.maximum(h1, 0.0).astype(jnp.bfloat16)

    # fc2 + ReLU : (tb, 512) @ (512, 128) + (1, 128)
    h2 = jnp.dot(h1, w2_ref[...], preferred_element_type=jnp.float32) + b2_ref[...]
    h2 = jnp.maximum(h2, 0.0).astype(jnp.bfloat16)

    # fc3 + ReLU : (tb, 128) @ (128, 128[=52 padded]) + (1, 128)
    h3 = jnp.dot(h2, w3_ref[...], preferred_element_type=jnp.float32) + b3_ref[...]
    h3 = jnp.maximum(h3, 0.0).astype(jnp.bfloat16)

    # fc4 (no activation) : (tb, 128) @ (128, 128[=10 padded]) + (1, 128)
    out = jnp.dot(h3, w4_ref[...], preferred_element_type=jnp.float32) + b4_ref[...]

    o_ref[...] = out.astype(o_ref.dtype)


def mnist_classifier_forward(x, params, block_b=256):
    """x: (B, 784) f32.  params: 4 x (bf16 (in_pad, out_pad) weight, f32 (1, out_pad) bias)."""
    (w1, b1), (w2, b2), (w3, b3), (w4, b4) = params
    B, F = x.shape
    k_pad = w1.shape[0]  # 896

    # Batch tile: keep M large for the MXU (256 matches v6e/v7x MXU rows,
    # 128 is fine on v5e); only shrink for tiny batches. Multiple of 16 for
    # bf16 sublane packing.
    tb = min(block_b, _round_up(B, 16))
    B_pad = _round_up(B, tb)
    n_tiles = B_pad // tb

    # Pad batch rows, lane-align the fc1 contraction dim, stream x as bf16.
    x = jnp.pad(x, ((0, B_pad - B), (0, k_pad - F))).astype(jnp.bfloat16)

    # Constant index_map => weights / biases DMA'd once and VMEM-resident
    # across all batch tiles; only x / out tiles move per grid step.
    def const_spec(arr):
        return pl.BlockSpec(arr.shape, lambda i: (0, 0))

    # Only shard the batch grid across v7x's two TensorCores when there is
    # enough work to amortize a second copy of the resident weights.
    semantics = ("parallel",) if n_tiles >= 4 else ("arbitrary",)

    out_pad = pl.pallas_call(
        mlp_kernel,
        out_shape=jax.ShapeDtypeStruct((B_pad, 128), jnp.float32),
        grid=(n_tiles,),
        in_specs=[
            pl.BlockSpec((tb, k_pad), lambda i: (i, 0)),
            const_spec(w1), const_spec(b1),
            const_spec(w2), const_spec(b2),
            const_spec(w3), const_spec(b3),
            const_spec(w4), const_spec(b4),
        ],
        out_specs=pl.BlockSpec((tb, 128), lambda i: (i, 0)),
        compiler_params=pltpu.CompilerParams(dimension_semantics=semantics),
    )(x, w1, b1, w2, b2, w3, b3, w4, b4)

    # Lane-dense padded output -> logical (B, 10).
    return out_pad[:B, :10]


def init_linear(key, fan_in, fan_out, pad_in=None, pad_out=None):
    """Deterministic init mimicking nn.Linear (uniform +/- 1/sqrt(fan_in)).
    Weight stored as (in, out) bf16, zero-padded to (pad_in, pad_out) for
    lane-dense layout; bias stored as (1, pad_out) f32 (zero-padded)."""
    pad_in = pad_in or fan_in
    pad_out = pad_out or fan_out
    kw, kb = jax.random.split(key)
    bound = 1.0 / jnp.sqrt(jnp.float32(fan_in))
    w = jax.random.uniform(kw, (fan_in, fan_out), jnp.float32, -bound, bound)
    b = jax.random.uniform(kb, (1, fan_out), jnp.float32, -bound, bound)
    w = jnp.pad(w, ((0, pad_in - fan_in), (0, pad_out - fan_out)))
    b = jnp.pad(b, ((0, 0), (0, pad_out - fan_out)))
    return w.astype(jnp.bfloat16), b


if __name__ == "__main__":
    key = jax.random.PRNGKey(0)
    k_x, k1, k2, k3, k4 = jax.random.split(key, 5)

    # Flattened 28x28 "MNIST" images.
    B = 256
    x = jax.random.normal(k_x, (B, IN_FEATURES), jnp.float32)

    params = (
        init_linear(k1, 784, 512, pad_in=K_PAD),            # K: 784 -> 896
        init_linear(k2, 512, 128),
        init_linear(k3, 128, 52, pad_out=128),               # 52 -> 128 lanes
        init_linear(k4, 52, 10, pad_in=128, pad_out=128),    # 10 -> 128 lanes
    )

    # block_b=128 -> two batch tiles: exercises the VMEM-resident-weights /
    # pipelined-batch path while keeping M >= 128 rows per tile.
    out = mnist_classifier_forward(x, params, block_b=128)
    out = jax.block_until_ready(out)

    # Pure-JAX reference following the kernel's exact numerics:
    # bf16 weights + bf16 activations, f32 accumulation, f32 bias add.
    act = jnp.pad(x, ((0, 0), (0, K_PAD - IN_FEATURES)))
    for i, (w, b) in enumerate(params):
        act = jnp.dot(act.astype(jnp.bfloat16), w,
                      preferred_element_type=jnp.float32) + b
        if i < 3:
            act = jnp.maximum(act, 0.0)
    ref = act[:, :10]

    assert out.shape == (B, 10)
    assert jnp.allclose(out, ref, atol=1e-2, rtol=1e-2), \
        float(jnp.max(jnp.abs(out - ref)))

    print("KERNEL_OK")
</pallas_src>

<mosaic_0001>
module attributes {stable_mosaic.version = 11 : i64} {
  func.func @mlp_kernel(%arg0: i32, %arg1: memref<128x896xbf16, #tpu.memory_space<vmem>>, %arg2: memref<896x512xbf16, #tpu.memory_space<vmem>>, %arg3: memref<1x512xf32, #tpu.memory_space<vmem>>, %arg4: memref<512x128xbf16, #tpu.memory_space<vmem>>, %arg5: memref<1x128xf32, #tpu.memory_space<vmem>>, %arg6: memref<128x128xbf16, #tpu.memory_space<vmem>>, %arg7: memref<1x128xf32, #tpu.memory_space<vmem>>, %arg8: memref<128x128xbf16, #tpu.memory_space<vmem>>, %arg9: memref<1x128xf32, #tpu.memory_space<vmem>>, %arg10: memref<128x128xf32, #tpu.memory_space<vmem>>) attributes {dimension_semantics = [#tpu.dimension_semantics<arbitrary>], iteration_bounds = array<i64: 2>, scalar_prefetch = 0 : i64, scratch_operands = 0 : i64, tpu.core_type = #tpu.core_type<tc>, window_params = [{transform_indices = @transform_0, window_bounds = array<i64: 128, 896>}, {pipeline_mode = #tpu.pipeline_mode<synchronous>, transform_indices = @transform_1, window_bounds = array<i64: 896, 512>}, {pipeline_mode = #tpu.pipeline_mode<synchronous>, transform_indices = @transform_2, window_bounds = array<i64: 1, 512>}, {pipeline_mode = #tpu.pipeline_mode<synchronous>, transform_indices = @transform_3, window_bounds = array<i64: 512, 128>}, {pipeline_mode = #tpu.pipeline_mode<synchronous>, transform_indices = @transform_4, window_bounds = array<i64: 1, 128>}, {pipeline_mode = #tpu.pipeline_mode<synchronous>, transform_indices = @transform_5, window_bounds = array<i64: 128, 128>}, {pipeline_mode = #tpu.pipeline_mode<synchronous>, transform_indices = @transform_6, window_bounds = array<i64: 1, 128>}, {pipeline_mode = #tpu.pipeline_mode<synchronous>, transform_indices = @transform_7, window_bounds = array<i64: 128, 128>}, {pipeline_mode = #tpu.pipeline_mode<synchronous>, transform_indices = @transform_8, window_bounds = array<i64: 1, 128>}, {transform_indices = @transform_9, window_bounds = array<i64: 128, 128>}]} {
    %c0 = arith.constant 0 : index
    %c0_0 = arith.constant 0 : index
    %0 = vector.load %arg1[%c0, %c0_0] : memref<128x896xbf16, #tpu.memory_space<vmem>>, vector<128x896xbf16>
    %c0_1 = arith.constant 0 : index
    %c0_2 = arith.constant 0 : index
    %1 = vector.load %arg2[%c0_1, %c0_2] : memref<896x512xbf16, #tpu.memory_space<vmem>>, vector<896x512xbf16>
    %cst = arith.constant dense<0.000000e+00> : vector<128x512xf32>
    %2 = tpu.matmul %0, %1, %cst {dimension_numbers = #tpu.dot_dimension_numbers<[1], [0], [0], [1], [0, 0, 1, 1], [], []>} : vector<128x896xbf16>, vector<896x512xbf16>, vector<128x512xf32> -> vector<128x512xf32>
    %c0_3 = arith.constant 0 : index
    %c0_4 = arith.constant 0 : index
    %3 = vector.load %arg3[%c0_3, %c0_4] : memref<1x512xf32, #tpu.memory_space<vmem>>, vector<1x512xf32>
    %4 = vector.broadcast %3 : vector<1x512xf32> to vector<128x512xf32>
    %5 = arith.addf %2, %4 : vector<128x512xf32>
    %cst_5 = arith.constant 0.000000e+00 : f32
    %6 = vector.broadcast %cst_5 : f32 to vector<128x512xf32>
    %7 = arith.maximumf %5, %6 : vector<128x512xf32>
    %8 = arith.truncf %7 : vector<128x512xf32> to vector<128x512xbf16>
    %c0_6 = arith.constant 0 : index
    %c0_7 = arith.constant 0 : index
    %9 = vector.load %arg4[%c0_6, %c0_7] : memref<512x128xbf16, #tpu.memory_space<vmem>>, vector<512x128xbf16>
    %cst_8 = arith.constant dense<0.000000e+00> : vector<128x128xf32>
    %10 = tpu.matmul %8, %9, %cst_8 {dimension_numbers = #tpu.dot_dimension_numbers<[1], [0], [0], [1], [0, 0, 1, 1], [], []>} : vector<128x512xbf16>, vector<512x128xbf16>, vector<128x128xf32> -> vector<128x128xf32>
    %c0_9 = arith.constant 0 : index
    %c0_10 = arith.constant 0 : index
    %11 = vector.load %arg5[%c0_9, %c0_10] : memref<1x128xf32, #tpu.memory_space<vmem>>, vector<1x128xf32>
    %12 = vector.broadcast %11 : vector<1x128xf32> to vector<128x128xf32>
    %13 = arith.addf %10, %12 : vector<128x128xf32>
    %cst_11 = arith.constant 0.000000e+00 : f32
    %14 = vector.broadcast %cst_11 : f32 to vector<128x128xf32>
    %15 = arith.maximumf %13, %14 : vector<128x128xf32>
    %16 = arith.truncf %15 : vector<128x128xf32> to vector<128x128xbf16>
    %c0_12 = arith.constant 0 : index
    %c0_13 = arith.constant 0 : index
    %17 = vector.load %arg6[%c0_12, %c0_13] : memref<128x128xbf16, #tpu.memory_space<vmem>>, vector<128x128xbf16>
    %cst_14 = arith.constant dense<0.000000e+00> : vector<128x128xf32>
    %18 = tpu.matmul %16, %17, %cst_14 {dimension_numbers = #tpu.dot_dimension_numbers<[1], [0], [0], [1], [0, 0, 1, 1], [], []>} : vector<128x128xbf16>, vector<128x128xbf16>, vector<128x128xf32> -> vector<128x128xf32>
    %c0_15 = arith.constant 0 : index
    %c0_16 = arith.constant 0 : index
    %19 = vector.load %arg7[%c0_15, %c0_16] : memref<1x128xf32, #tpu.memory_space<vmem>>, vector<1x128xf32>
    %20 = vector.broadcast %19 : vector<1x128xf32> to vector<128x128xf32>
    %21 = arith.addf %18, %20 : vector<128x128xf32>
    %cst_17 = arith.constant 0.000000e+00 : f32
    %22 = vector.broadcast %cst_17 : f32 to vector<128x128xf32>
    %23 = arith.maximumf %21, %22 : vector<128x128xf32>
    %24 = arith.truncf %23 : vector<128x128xf32> to vector<128x128xbf16>
    %c0_18 = arith.constant 0 : index
    %c0_19 = arith.constant 0 : index
    %25 = vector.load %arg8[%c0_18, %c0_19] : memref<128x128xbf16, #tpu.memory_space<vmem>>, vector<128x128xbf16>
    %cst_20 = arith.constant dense<0.000000e+00> : vector<128x128xf32>
    %26 = tpu.matmul %24, %25, %cst_20 {dimension_numbers = #tpu.dot_dimension_numbers<[1], [0], [0], [1], [0, 0, 1, 1], [], []>} : vector<128x128xbf16>, vector<128x128xbf16>, vector<128x128xf32> -> vector<128x128xf32>
    %c0_21 = arith.constant 0 : index
    %c0_22 = arith.constant 0 : index
    %27 = vector.load %arg9[%c0_21, %c0_22] : memref<1x128xf32, #tpu.memory_space<vmem>>, vector<1x128xf32>
    %28 = vector.broadcast %27 : vector<1x128xf32> to vector<128x128xf32>
    %29 = arith.addf %26, %28 : vector<128x128xf32>
    %c0_23 = arith.constant 0 : index
    %c0_24 = arith.constant 0 : index
    %30 = vector.load %arg10[%c0_23, %c0_24] : memref<128x128xf32, #tpu.memory_space<vmem>>, vector<128x128xf32>
    tpu.vector_store %arg10[%c0_23, %c0_24], %29 {strides = array<i32>} : memref<128x128xf32, #tpu.memory_space<vmem>>, vector<128x128xf32>,
    return
  }
  func.func @transform_0(%arg0: i32) -> (i32, i32) {
    %c0_i32 = arith.constant 0 : i32
    %c0_i32_0 = arith.constant 0 : i32
    return %arg0, %c0_i32 : i32, i32
  }
  func.func @transform_1(%arg0: i32) -> (i32, i32) {
    %c0_i32 = arith.constant 0 : i32
    %c0_i32_0 = arith.constant 0 : i32
    %c0_i32_1 = arith.constant 0 : i32
    return %c0_i32, %c0_i32_0 : i32, i32
  }
  func.func @transform_2(%arg0: i32) -> (i32, i32) {
    %c0_i32 = arith.constant 0 : i32
    %c0_i32_0 = arith.constant 0 : i32
    %c0_i32_1 = arith.constant 0 : i32
    return %c0_i32, %c0_i32_0 : i32, i32
  }
  func.func @transform_3(%arg0: i32) -> (i32, i32) {
    %c0_i32 = arith.constant 0 : i32
    %c0_i32_0 = arith.constant 0 : i32
    %c0_i32_1 = arith.constant 0 : i32
    return %c0_i32, %c0_i32_0 : i32, i32
  }
  func.func @transform_4(%arg0: i32) -> (i32, i32) {
    %c0_i32 = arith.constant 0 : i32
    %c0_i32_0 = arith.constant 0 : i32
    %c0_i32_1 = arith.constant 0 : i32
    return %c0_i32, %c0_i32_0 : i32, i32
  }
  func.func @transform_5(%arg0: i32) -> (i32, i32) {
    %c0_i32 = arith.constant 0 : i32
    %c0_i32_0 = arith.constant 0 : i32
    %c0_i32_1 = arith.constant 0 : i32
    return %c0_i32, %c0_i32_0 : i32, i32
  }
  func.func @transform_6(%arg0: i32) -> (i32, i32) {
    %c0_i32 = arith.constant 0 : i32
    %c0_i32_0 = arith.constant 0 : i32
    %c0_i32_1 = arith.constant 0 : i32
    return %c0_i32, %c0_i32_0 : i32, i32
  }
  func.func @transform_7(%arg0: i32) -> (i32, i32) {
    %c0_i32 = arith.constant 0 : i32
    %c0_i32_0 = arith.constant 0 : i32
    %c0_i32_1 = arith.constant 0 : i32
    return %c0_i32, %c0_i32_0 : i32, i32
  }
  func.func @transform_8(%arg0: i32) -> (i32, i32) {
    %c0_i32 = arith.constant 0 : i32
    %c0_i32_0 = arith.constant 0 : i32
    %c0_i32_1 = arith.constant 0 : i32
    return %c0_i32, %c0_i32_0 : i32, i32
  }
  func.func @transform_9(%arg0: i32) -> (i32, i32) {
    %c0_i32 = arith.constant 0 : i32
    %c0_i32_0 = arith.constant 0 : i32
    return %arg0, %c0_i32 : i32, i32
  }
}

</mosaic_0001>

<bundles_post_ra>
// kernel: tpu_custom_call.1
= control target key start
LH: loop header
LB: loop body
LE: loop exit
PB: predicated region body
PF: predicated region fallthrough
CT: control target
= control target key end

     0   :  { %s6257_s0 = inlined_call_operand.hbm [shape: bf16[256,896], index: 0, kind: input, shape index: {}]   ;;  %s6258_s1 = inlined_call_operand.hbm [shape: bf16[896,512], index: 1, kind: input, shape index: {}]   ;;  %s6259_s2 = inlined_call_operand.vmem [shape: f32[1,512], index: 2, kind: input, shape index: {}]   ;;  %s6260_s3 = inlined_call_operand.hbm [shape: bf16[512,128], index: 3, kind: input, shape index: {}]   ;;  %s6261_s4 = inlined_call_operand.vmem [shape: f32[1,128], index: 4, kind: input, shape index: {}]   ;;  %s6262_s5 = inlined_call_operand.hbm [shape: bf16[128,128], index: 5, kind: input, shape index: {}]   ;;  %s6263_s6 = inlined_call_operand.vmem [shape: f32[1,128], index: 6, kind: input, shape index: {}]   ;;  %s6264_s7 = inlined_call_operand.hbm [shape: bf16[128,128], index: 7, kind: input, shape index: {}]   ;;  %s6265_s8 = inlined_call_operand.vmem [shape: f32[1,128], index: 8, kind: input, shape index: {}]   ;;  %s6266_s9 = inlined_call_operand.hbm [shape: f32[256,128], index: 9, kind: output, shape index: {}]  }
   0x1   :  { %6273 = sst [smem:[#allocation18_spill]] %s6265_s8 }
   0x2   :  { %6274 = sst [smem:[#allocation19_spill]] %s6266_s9 }
   0x3   :  { %14 = vsyncpa [#allocation3], 0 }
   0x4   :  { %16 = vsyncpa [#allocation3 + $0x1], 0 }
   0x5   :  { %17 = vsyncpa [#allocation6], 0 }
   0x6   :  { %18 = vsyncpa [#allocation9], 0 }
   0x7   :  { %19 = vsyncpa [#allocation4], 0 }
   0x8   :  { %21 = vsyncpa [#allocation4 + $0x1], 0  ;;  %s5792_s30 = smov 0   ;;  %s5794_s10 = smov 0  }
   0x9   :  { %s5796_s11 = smov 0   ;;  %s5798_s12 = smov 0  }
   0xa LB: > { %6275 = sst [smem:[#allocation16_spill]] %s5713_s30  ;;  %s5813_s13 = sadd.s32 4294967295, %s5725_s12   ;;  %s5725_s12 = sphi %s5798_s12, %s6300_s12   ;;  %s5721_s11 = sphi %s5796_s11, %s6299_s11   ;;  %s5717_s10 = sphi %s5794_s10, %s6298_s10   ;;  %s5713_s30 = sphi %s5792_s30, %s6297_s30  }
   0xb   : > { %s4113_s14 = sadd.s32 4294967294, %s5725_s12   ;;  %p47_p0 = scmp.ne.s32.totalorder %s5717_s10, %s5713_s30 }
   0xc   : > { %p6267_p1 = scmp.eq.s32.totalorder %s5813_s13, 0  ;;  %p245_p3 = scmp.eq.s32.totalorder %s4113_s14, 1 }
   0xd   : > { %p4114_p5 = scmp.ge.s32.totalorder %s5725_s12, 1  ;;  %p252_p7 = scmp.lt.s32.totalorder %s5725_s12, 3 }
   0xe   : > { %p5822_p4 = por %p6267_p1, %p47_p0  ;;  %p5827_p6 = por %p245_p3, %p47_p0 }
   0xf   : > { %p5832_p8 = pnand %p4114_p5, %p252_p7  ;;  %s5727_s18 = smov [#allocation5]  }
  0x10   : > { %s6276_s15 = scalar_select %p5822_p4, 1, 0 }
  0x11   : > { %s6277_s16 = scalar_select %p5827_p6, 1, 0 }
  0x12   : > { %s6279_s17 = scalar_select %p5832_p8, 1, 0 }
  0x13   : > { %6278 = sst [smem:[#allocation17_spill]] %s6277_s16  ;;  %s264_s19 = sshll.u32 %s5727_s18, 4  ;;  %s265_s19 = int_to_ptr.vmem [resolvable:$true] %s264_s19 }
  0x14   : > { %p4969_p9 = pneg %p5832_p8  ;;  %s5728_s21 = smov [#allocation8]  }
  0x15   : > { %s296_s22 = sshll.u32 %s5728_s21, 4  ;;  %s5509_s25 = scalar_lea.hbm %s6258_s1, 28672  ;;  %s297_s22 = int_to_ptr.vmem [resolvable:$true] %s296_s22 }
  0x16   : > { %p5841_p11 = pnand %p4969_p9, %p6267_p1  ;;  %p5510_p12 = scmp.ne.s32.totalorder %s6258_s1, %s5509_s25 }
  0x17   : > { %p5516_p5 = scmp.lt.u32.totalorder %s5509_s25, %s6258_s1 }
  0x18   : > { %p5853_p13 = pneg %p5841_p11 }
  0x1a   : > { %p5512_p0 = pnand %p5853_p13, %p5510_p12 }
  0x1c   : > { %p5513_p3 = pneg %p5512_p0 }
  0x1e   : > { %p5518_p7 = pnand %p5516_p5, %p5513_p3 }
  0x20   : > { %5521 = shalt.err (!%p5518_p7)
}
  0x21   : > { %s5522_s18 = scalar_lea.vmem %s265_s19, 28672  ;;  %p5530_p2 = scmp.lt.s32.totalorder %s265_s19, %s265_s19 }
  0x22   : > { %p5523_p9 = scmp.ne.s32.totalorder %s265_s19, %s5522_s18  ;;  %p5531_p6 = scmp.lt.s32.totalorder %s5522_s18, %s5522_s18 }
  0x24   : > { %p5525_p10 = pnand %p5523_p9, %p5853_p13  ;;  %p5532_p4 = por %p5531_p6, %p5530_p2 }
  0x26   : > { %p5526_p1 = pneg %p5525_p10 }
  0x28   : > { %p5533_p8 = pnand %p5532_p4, %p5526_p1 }
  0x2a   : > { %5536 = shalt.err (!%p5533_p8)
}
  0x2b   : > { %s5729_s21 = smov 256   ;;  %s5730_s23 = smov 16  }
  0x2c   : > { %4972 = dma.hbm_to_vmem [thread:$0]  (!%p5841_p11), %s6258_s1, 28672, %s265_s19, [#allocation6], %s5729_s21, %s5729_s21, %s5730_s23  }
  0x2d   : > { %s5731_s26 = smov [#allocation7]   ;;  %s5537_s16 = scalar_lea.hbm %s6262_s5, 1024 }
  0x2e   : > { %s280_s27 = sshll.u32 %s5731_s26, 4  ;;  %p5538_p1 = scmp.ne.s32.totalorder %s6262_s5, %s5537_s16  ;;  %s281_s27 = int_to_ptr.vmem [resolvable:$true] %s280_s27 }
  0x2f   : > { %p5544_p6 = scmp.lt.u32.totalorder %s5537_s16, %s6262_s5 }
  0x30   : > { %p5540_p2 = pnand %p5538_p1, %p5853_p13 }
  0x32   : > { %p5541_p4 = pneg %p5540_p2 }
  0x34   : > { %p5546_p8 = pnand %p5544_p6, %p5541_p4 }
  0x36   : > { %5549 = shalt.err (!%p5546_p8)
}
  0x37   : > { %s5550_s19 = scalar_lea.vmem %s297_s22, 1024  ;;  %p5558_p3 = scmp.lt.s32.totalorder %s297_s22, %s297_s22 }
  0x38   : > { %p5551_p10 = scmp.ne.s32.totalorder %s297_s22, %s5550_s19  ;;  %p5559_p5 = scmp.lt.s32.totalorder %s5550_s19, %s5550_s19 }
  0x3a   : > { %p5553_p12 = pnand %p5551_p10, %p5853_p13  ;;  %p5560_p7 = por %p5559_p5, %p5558_p3 }
  0x3c   : > { %p5554_p0 = pneg %p5553_p12 }
  0x3e   : > { %p5561_p9 = pnand %p5560_p7, %p5554_p0 }
  0x40   : > { %5564 = shalt.err (!%p5561_p9)
}
  0x41   : > { %s5732_s30 = smov 64   ;;  %s5733_s21 = smov 4  }
  0x42   : > { %4978 = dma.hbm_to_vmem [thread:$0]  (!%p5841_p11), %s6262_s5, 1024, %s297_s22, [#allocation9], %s5732_s30, %s5732_s30, %s5733_s21  }
  0x43   : > { %s5565_s24 = scalar_lea.hbm %s6260_s3, 4096 }
  0x44   : > { %p5566_p1 = scmp.ne.s32.totalorder %s6260_s3, %s5565_s24  ;;  %p5572_p6 = scmp.lt.u32.totalorder %s5565_s24, %s6260_s3 }
  0x46   : > { %p5568_p2 = pnand %p5566_p1, %p5853_p13 }
  0x48   : > { %p5569_p4 = pneg %p5568_p2 }
  0x4a   : > { %p5574_p8 = pnand %p5572_p6, %p5569_p4 }
  0x4c   : > { %5577 = shalt.err (!%p5574_p8)
}
  0x4d   : > { %s5578_s18 = scalar_lea.vmem %s281_s27, 4096  ;;  %p5586_p3 = scmp.lt.s32.totalorder %s281_s27, %s281_s27 }
  0x4e   : > { %p5579_p10 = scmp.ne.s32.totalorder %s281_s27, %s5578_s18  ;;  %p5587_p5 = scmp.lt.s32.totalorder %s5578_s18, %s5578_s18 }
  0x50   : > { %p5581_p12 = pnand %p5579_p10, %p5853_p13  ;;  %p5588_p7 = por %p5587_p5, %p5586_p3 }
  0x52   : > { %p5582_p0 = pneg %p5581_p12 }
  0x54   : > { %p5589_p9 = pnand %p5588_p7, %p5582_p0 }
  0x56   : > { %5592 = shalt.err (!%p5589_p9)
}
  0x57   : > { %4975 = dma.hbm_to_vmem [thread:$0]  (!%p5841_p11), %s6260_s3, 4096, %s281_s27, [#allocation6], %s5732_s30, %s5732_s30, %s5733_s21  }
  0x58   : > { %s5734_s8 = smov [#allocation10]   ;;  %s5593_s24 = scalar_lea.hbm %s6264_s7, 1024 }
  0x59   : > { %s312_s9 = sshll.u32 %s5734_s8, 4  ;;  %p5594_p1 = scmp.ne.s32.totalorder %s6264_s7, %s5593_s24  ;;  %s313_s9 = int_to_ptr.vmem [resolvable:$true] %s312_s9 }
  0x5a   : > { %p5600_p6 = scmp.lt.u32.totalorder %s5593_s24, %s6264_s7 }
  0x5b   : > { %p5596_p2 = pnand %p5594_p1, %p5853_p13 }
  0x5d   : > { %p5597_p4 = pneg %p5596_p2 }
  0x5f   : > { %p5602_p8 = pnand %p5600_p6, %p5597_p4 }
  0x61   : > { %5605 = shalt.err (!%p5602_p8)
}
  0x62   : > { %s5606_s27 = scalar_lea.vmem %s313_s9, 1024  ;;  %p5614_p3 = scmp.lt.s32.totalorder %s313_s9, %s313_s9 }
  0x63   : > { %p5607_p10 = scmp.ne.s32.totalorder %s313_s9, %s5606_s27  ;;  %p5615_p5 = scmp.lt.s32.totalorder %s5606_s27, %s5606_s27 }
  0x65   : > { %p5609_p12 = pnand %p5607_p10, %p5853_p13  ;;  %p5616_p7 = por %p5615_p5, %p5614_p3 }
  0x67   : > { %p5610_p0 = pneg %p5609_p12 }
  0x69   : > { %p5617_p9 = pnand %p5616_p7, %p5610_p0 }
  0x6b   : > { %5620 = shalt.err (!%p5617_p9)
}
  0x6c   : > { %4981 = dma.hbm_to_vmem [thread:$0]  (!%p5841_p11), %s6264_s7, 1024, %s313_s9, [#allocation9], %s5732_s30, %s5732_s30, %s5733_s21  }
  0x6d   : > { %s5933_s28 = sadd.s32 1, %s5725_s12   ;;  %s34_s20 = sadd.s32 1, %s5721_s11 }
  0x6e   : > { %s31_s19 = ssub.s32 %s5725_s12, %s5933_s28  ;;  %p41_p13 = scmp.ne.s32.totalorder %s5721_s11, %s5717_s10 }
  0x6f   : > { %p32_p1 = scmp.eq.s32.totalorder %s31_s19, 0  ;;  %p42_p2 = scmp.eq.s32.totalorder %s5725_s12, 0 }
  0x70   : > { %p6282_p4 = scmp.eq.s32.totalorder %s5813_s13, 1  ;;  %p4994_p8 = scmp.lt.s32.totalorder %s5725_s12, 2 }
  0x71   : > { %s5949_s16 = scalar_select %p32_p1, %s5721_s11, %s34_s20  }
  0x72   : > { %p5943_p6 = por %p6282_p4, %p41_p13  ;;  %p43_p10 = por %p42_p2, %p41_p13 }
  0x73   : > { %s329_s23 = sand.u32 1, %s5721_s11   ;;  %s4947_s30 = smul.u32 7168, %s5725_s12 }
  0x74   : > { %s4946_s24 = smul.u32 448, %s329_s23  ;;  %p5953_p11 = pnand %p4994_p8, %p43_p10 }
  0x75   : > { %s5960_s26 = scalar_lea.hbm %s6257_s0, %s4947_s30  ;;  %s5964_s27 = scalar_lea.sflag [#allocation3], %s329_s23 }
  0x76   : > { %s333_s29 = scalar_lea.vmem [#allocation2], %s4946_s24  ;;  %s5621_s18 = scalar_lea.hbm %s5960_s26, 7168 }
  0x77   : > { %s341_s14 = sshll.u32 %s333_s29, 4  ;;  %p5622_p12 = scmp.ne.s32.totalorder %s5960_s26, %s5621_s18  ;;  %s5962_s14 = int_to_ptr.vmem [resolvable:$true] %s341_s14 }
  0x78   : > { %p5623_p0 = pneg %p5953_p11  ;;  %s5626_s19 = scalar_lea.hbm %s6257_s0, 14336 }
  0x79   : > { %p5627_p7 = scmp.lt.u32.totalorder %s5960_s26, %s6257_s0  ;;  %p5628_p9 = scmp.lt.u32.totalorder %s5626_s19, %s5621_s18 }
  0x7a   : > { %p5624_p3 = pnand %p5623_p0, %p5622_p12  ;;  %p5630_p1 = scmp.lt.u32.totalorder %s5621_s18, %s5960_s26 }
  0x7b   : > { %p5629_p13 = por %p5628_p9, %p5627_p7 }
  0x7c   : > { %p5625_p5 = pneg %p5624_p3 }
  0x7d   : > { %p5631_p2 = por %p5630_p1, %p5629_p13 }
  0x7f   : > { %p5632_p4 = pnand %p5631_p2, %p5625_p5 }
  0x81   : > { %5635 = shalt.err (!%p5632_p4)
}
  0x82   : > { %s5636_s23 = scalar_lea.vmem %s5962_s14, 7168  ;;  %s5735_s24 = smov [#allocation2]  }
  0x83   : > { %p5637_p8 = scmp.ne.s32.totalorder %s5962_s14, %s5636_s23  ;;  %s5641_s25 = sshll.u32 %s5735_s24, 4  ;;  %s5642_s25 = int_to_ptr.vmem [resolvable:$false] %s5641_s25 }
  0x84   : > { %s5643_s29 = scalar_lea.vmem %s5642_s25, 14336  ;;  %p5644_p3 = scmp.lt.s32.totalorder %s5962_s14, %s5642_s25 }
  0x85   : > { %p5639_p10 = pnand %p5637_p8, %p5623_p0  ;;  %p5645_p7 = scmp.lt.s32.totalorder %s5643_s29, %s5636_s23 }
  0x87   : > { %p5640_p12 = pneg %p5639_p10  ;;  %p5646_p9 = por %p5645_p7, %p5644_p3 }
  0x89   : > { %p5647_p13 = pnand %p5646_p9, %p5640_p12 }
  0x8b   : > { %5650 = shalt.err (!%p5647_p13)
}
  0x8c   : > { %s5736_s18 = smov 448   ;;  %s5737_s22 = smov 28  }
  0x8d   : > { %4985 = dma.hbm_to_vmem [thread:$0]  (!%p5953_p11), %s5960_s26, 7168, %s5962_s14, %s5964_s27, %s5736_s18, %s5736_s18, %s5737_s22  }
  0x8e   : > { %p6285_p0 = scmp.ne.s32.totalorder %s6279_s17, 0 }
  0x8f   : > { %s5995_s20 = sand.u32 (!%p6285_p0), 1, %s5717_s10   ;;  %p6286_p5 = scmp.ne.s32.totalorder (!%p6285_p0), %s6276_s15, 0 }
  0x90   : > { %353 = sbr.rel (%p6285_p0) target bundleno = 1373 (0x55d), region = 56  ;;  %s356_s30 = scalar_lea.sflag (!%p6285_p0), [#allocation3], %s5995_s20 }
  0x91   : > { %s4948_s19 = smul.u32 (!%p6285_p0), 448, %s5995_s20 }
  0x93   : > { %s5999_s9 = scalar_lea.vmem (!%p6285_p0), [#allocation2], %s4948_s19 }
  0x97   : > { %5696 = dma.done.wait (%p6286_p5), %s356_s30, 7168  }
  0x98   : > { %5698 = vsyncadd (%p6286_p5), %s356_s30, 4294960128  ;;  %p6287_p11 = scmp.eq.s32.totalorder %s5813_s13, 0 }
  0x9a   : > { %5700 = dma.done.wait (%p6287_p11), [#allocation6], 32768   ;;  %p6288_p1 = pmov %p6287_p11 }
  0x9c   : > { %5702 = vsyncadd (%p6288_p1), [#allocation6], 4294934528  ;;  %p6289_p2 = pmov %p6288_p1 }
  0x9d   : > { %p6290_p4 = pmov %p6288_p1 }
  0x9e   : > { %5704 = dma.done.wait (%p6289_p2), [#allocation9], 2048  }
  0x9f   : > { %5706 = vsyncadd (%p6290_p4), [#allocation9], 4294965248  ;;  %v5045_v0 = vld [vmem:[#allocation5 + $0x4] ss:$16 sps:$4 sm:$0xff]   ;;  %v5047_v1 = vld [vmem:[#allocation5 + $0xc] ss:$16 sps:$4 sm:$0xff]  }
  0xa0   : > { %2131 = vmatprep.subr.bf16.mxu0 %v5045_v0  ;;  %v5049_v2 = vld [vmem:[#allocation5] ss:$16 sps:$4 sm:$0xff]   ;;  %v5050_v3 = vld [vmem:[#allocation5 + $0x8] ss:$16 sps:$4 sm:$0xff]   ;;  %2583 = vmatprep.subr.bf16.mxu1 %v5047_v1  ;;  %v5051_v4 = vld [vmem:[#allocation5 + $0x24] ss:$16 sps:$4 sm:$0xff]  }
  0xa1   : > { %2132 = vmatpush1.bf16.msra.mxu0 %v5049_v2  ;;  %2584 = vmatpush1.bf16.msra.mxu1 %v5050_v3  ;;  %v5053_v5 = vld [vmem:[#allocation5 + $0x2c] ss:$16 sps:$4 sm:$0xff]   ;;  %v5055_v6 = vld [vmem:[#allocation5 + $0x20] ss:$16 sps:$4 sm:$0xff]   ;;  %v5056_v7 = vld [vmem:[#allocation5 + $0x28] ss:$16 sps:$4 sm:$0xff]  }
  0xa2   : > { %2133 = vmatprep.subr.bf16.mxu0 %v5051_v4  ;;  %2585 = vmatprep.subr.bf16.mxu1 %v5053_v5  ;;  %v5057_v8 = vld [vmem:[#allocation5 + $0x44] ss:$16 sps:$4 sm:$0xff]   ;;  %v5059_v9 = vld [vmem:[#allocation5 + $0x4c] ss:$16 sps:$4 sm:$0xff]   ;;  %v5061_v10 = vld [vmem:[#allocation5 + $0x40] ss:$16 sps:$4 sm:$0xff]  }
  0xa3   : > { %v5062_v11 = vld [vmem:[#allocation5 + $0x48] ss:$16 sps:$4 sm:$0xff]   ;;  %v5063_v12 = vld [vmem:[#allocation5 + $0x64] ss:$16 sps:$4 sm:$0xff]   ;;  %v5065_v13 = vld [vmem:[#allocation5 + $0x6c] ss:$16 sps:$4 sm:$0xff]  }
  0xa4   : > { %v5067_v14 = vld [vmem:[#allocation5 + $0x60] ss:$16 sps:$4 sm:$0xff]   ;;  %v5068_v15 = vld [vmem:[#allocation5 + $0x68] ss:$16 sps:$4 sm:$0xff]   ;;  %v5069_v16 = vld [vmem:[#allocation5 + $0x84] ss:$16 sps:$4 sm:$0xff]  }
  0xa5   : > { %2134 = vmatpush1.bf16.msra.mxu0 %v5055_v6  ;;  %2586 = vmatpush1.bf16.msra.mxu1 %v5056_v7  ;;  %v5071_v17 = vld [vmem:[#allocation5 + $0x8c] ss:$16 sps:$4 sm:$0xff]   ;;  %v5073_v18 = vld [vmem:[#allocation5 + $0x80] ss:$16 sps:$4 sm:$0xff]   ;;  %v5074_v19 = vld [vmem:[#allocation5 + $0x88] ss:$16 sps:$4 sm:$0xff]  }
  0xa6   : > { %2135 = vmatprep.subr.bf16.mxu0 %v5057_v8  ;;  %2587 = vmatprep.subr.bf16.mxu1 %v5059_v9  ;;  %v5075_v20 = vld [vmem:[#allocation5 + $0xa4] ss:$16 sps:$4 sm:$0xff]   ;;  %v5077_v21 = vld [vmem:[#allocation5 + $0xac] ss:$16 sps:$4 sm:$0xff]   ;;  %v5079_v22 = vld [vmem:[#allocation5 + $0xa0] ss:$16 sps:$4 sm:$0xff]  }
  0xa7   : > { %v5080_v23 = vld [vmem:[#allocation5 + $0xa8] ss:$16 sps:$4 sm:$0xff]   ;;  %v5081_v24 = vld [vmem:[#allocation5 + $0xc4] ss:$16 sps:$4 sm:$0xff]   ;;  %v5083_v25 = vld [vmem:[#allocation5 + $0xcc] ss:$16 sps:$4 sm:$0xff]  }
  0xa8   : > { %v5085_v26 = vld [vmem:[#allocation5 + $0xc0] ss:$16 sps:$4 sm:$0xff]   ;;  %v5086_v27 = vld [vmem:[#allocation5 + $0xc8] ss:$16 sps:$4 sm:$0xff]   ;;  %v5087_v28 = vld [vmem:[#allocation5 + $0xe4] ss:$16 sps:$4 sm:$0xff]  }
  0xa9   : > { %2136 = vmatpush1.bf16.msra.mxu0 %v5061_v10  ;;  %2588 = vmatpush1.bf16.msra.mxu1 %v5062_v11  ;;  %v5089_v29 = vld [vmem:[#allocation5 + $0xec] ss:$16 sps:$4 sm:$0xff]   ;;  %v5091_v30 = vld [vmem:[#allocation5 + $0xe0] ss:$16 sps:$4 sm:$0xff]   ;;  %v5092_v31 = vld [vmem:[#allocation5 + $0xe8] ss:$16 sps:$4 sm:$0xff]  }
  0xaa   : > { %2137 = vmatprep.subr.bf16.mxu0 %v5063_v12  ;;  %2589 = vmatprep.subr.bf16.mxu1 %v5065_v13  ;;  %v5093_v32 = vld [vmem:[#allocation5 + $0x104] ss:$16 sps:$4 sm:$0xff]   ;;  %v5095_v33 = vld [vmem:[#allocation5 + $0x10c] ss:$16 sps:$4 sm:$0xff]   ;;  %v5097_v34 = vld [vmem:[#allocation5 + $0x100] ss:$16 sps:$4 sm:$0xff]  }
  0xab   : > { %v5098_v35 = vld [vmem:[#allocation5 + $0x108] ss:$16 sps:$4 sm:$0xff]   ;;  %v5099_v36 = vld [vmem:[#allocation5 + $0x124] ss:$16 sps:$4 sm:$0xff]   ;;  %v5101_v37 = vld [vmem:[#allocation5 + $0x12c] ss:$16 sps:$4 sm:$0xff]  }
  0xac   : > { %v5103_v38 = vld [vmem:[#allocation5 + $0x120] ss:$16 sps:$4 sm:$0xff]   ;;  %v5104_v39 = vld [vmem:[#allocation5 + $0x128] ss:$16 sps:$4 sm:$0xff]   ;;  %v5105_v40 = vld [vmem:[#allocation5 + $0x144] ss:$16 sps:$4 sm:$0xff]  }
  0xad   : > { %2138 = vmatpush1.bf16.msra.mxu0 %v5067_v14  ;;  %2590 = vmatpush1.bf16.msra.mxu1 %v5068_v15  ;;  %v5107_v41 = vld [vmem:[#allocation5 + $0x14c] ss:$16 sps:$4 sm:$0xff]   ;;  %v5109_v42 = vld [vmem:[#allocation5 + $0x140] ss:$16 sps:$4 sm:$0xff]   ;;  %v5110_v43 = vld [vmem:[#allocation5 + $0x148] ss:$16 sps:$4 sm:$0xff]  }
  0xae   : > { %2139 = vmatprep.subr.bf16.mxu0 %v5069_v16  ;;  %2591 = vmatprep.subr.bf16.mxu1 %v5071_v17  ;;  %v5111_v44 = vld [vmem:[#allocation5 + $0x164] ss:$16 sps:$4 sm:$0xff]   ;;  %v5113_v45 = vld [vmem:[#allocation5 + $0x16c] ss:$16 sps:$4 sm:$0xff]   ;;  %v5115_v46 = vld [vmem:[#allocation5 + $0x160] ss:$16 sps:$4 sm:$0xff]  }
  0xaf   : > { %v5116_v47 = vld [vmem:[#allocation5 + $0x168] ss:$16 sps:$4 sm:$0xff]   ;;  %v5143_v48 = vld [vmem:[%s5999_s9 + $0x4] ss:$28 sps:$4 sm:$0xff]   ;;  %v5119_v50 = vld [vmem:[#allocation5 + $0x18c] ss:$16 sps:$4 sm:$0xff]  }
  0xb0   : > { %v5117_v49 = vld [vmem:[#allocation5 + $0x184] ss:$16 sps:$4 sm:$0xff]   ;;  %2163 = vmatprep.mubr.bf16.mxu0 %v5143_v48  ;;  %2615 = vmatprep.mubr.bf16.mxu1 %v5143_v48  ;;  %v5121_v51 = vld [vmem:[#allocation5 + $0x180] ss:$16 sps:$4 sm:$0xff]   ;;  %v5122_v52 = vld [vmem:[#allocation5 + $0x188] ss:$16 sps:$4 sm:$0xff]  }
  0xb1   : > { %2140 = vmatpush1.bf16.msra.mxu0 %v5073_v18  ;;  %2592 = vmatpush1.bf16.msra.mxu1 %v5074_v19  ;;  %v5123_v53 = vld [vmem:[#allocation5 + $0x1a4] ss:$16 sps:$4 sm:$0xff]   ;;  %v5125_v54 = vld [vmem:[#allocation5 + $0x1ac] ss:$16 sps:$4 sm:$0xff]   ;;  %v5127_v55 = vld [vmem:[#allocation5 + $0x1a0] ss:$16 sps:$4 sm:$0xff]  }
  0xb2   : > { %2141 = vmatprep.subr.bf16.mxu0 %v5075_v20  ;;  %2593 = vmatprep.subr.bf16.mxu1 %v5077_v21  ;;  %v5128_v56 = vld [vmem:[#allocation5 + $0x1a8] ss:$16 sps:$4 sm:$0xff]   ;;  %v5129_v57 = vld [vmem:[#allocation5 + $0x1c4] ss:$16 sps:$4 sm:$0xff]   ;;  %v5131_v58 = vld [vmem:[#allocation5 + $0x1cc] ss:$16 sps:$4 sm:$0xff]  }
  0xb3   : > { %v5133_v59 = vld [vmem:[#allocation5 + $0x1c0] ss:$16 sps:$4 sm:$0xff]   ;;  %v5134_v60 = vld [vmem:[#allocation5 + $0x1c8] ss:$16 sps:$4 sm:$0xff]   ;;  %v5135_v61 = vld [vmem:[#allocation5 + $0x1e4] ss:$16 sps:$4 sm:$0xff]  }
  0xb4   : > { %v5137_v62 = vld [vmem:[#allocation5 + $0x1ec] ss:$16 sps:$4 sm:$0xff]   ;;  %v5139_v63 = vld [vmem:[#allocation5 + $0x1e0] ss:$16 sps:$4 sm:$0xff]   ;;  %v5140_v0 = vld [vmem:[#allocation5 + $0x1e8] ss:$16 sps:$4 sm:$0xff]  }
  0xb5   : > { %2142 = vmatpush1.bf16.msra.mxu0 %v5079_v22  ;;  %2594 = vmatpush1.bf16.msra.mxu1 %v5080_v23  ;;  %v5146_v1 = vld [vmem:[#allocation5 + $0x204] ss:$16 sps:$4 sm:$0xff]   ;;  %v5149_v2 = vld [vmem:[#allocation5 + $0x20c] ss:$16 sps:$4 sm:$0xff]   ;;  %v5144_v4 = vld [vmem:[#allocation5 + $0x200] ss:$16 sps:$4 sm:$0xff]  }
  0xb6   : > { %2143 = vmatprep.subr.bf16.mxu0 %v5081_v24  ;;  %2595 = vmatprep.subr.bf16.mxu1 %v5083_v25  ;;  %v5141_v3 = vld [vmem:[%s5999_s9] ss:$28 sps:$4 sm:$0xff]   ;;  %v5147_v5 = vld [vmem:[#allocation5 + $0x208] ss:$16 sps:$4 sm:$0xff]   ;;  %v5152_v6 = vld [vmem:[#allocation5 + $0x224] ss:$16 sps:$4 sm:$0xff]  }
  0xb7   : > { %v5155_v7 = vld [vmem:[#allocation5 + $0x22c] ss:$16 sps:$4 sm:$0xff]   ;;  %v5150_v9 = vld [vmem:[#allocation5 + $0x220] ss:$16 sps:$4 sm:$0xff]   ;;  %v5153_v10 = vld [vmem:[#allocation5 + $0x228] ss:$16 sps:$4 sm:$0xff]  }
  0xb8   : > { %v5156_v8 = vld [vmem:[%s5999_s9 + $0x3c] ss:$28 sps:$4 sm:$0xff]   ;;  %v5161_v11 = vld [vmem:[#allocation5 + $0x244] ss:$16 sps:$4 sm:$0xff]   ;;  %v5159_v14 = vld [vmem:[#allocation5 + $0x240] ss:$16 sps:$4 sm:$0xff]  }
  0xb9   : > { %2144 = vmatpush1.bf16.msra.mxu0 %v5085_v26  ;;  %2596 = vmatpush1.bf16.msra.mxu1 %v5086_v27  ;;  %v5164_v12 = vld [vmem:[#allocation5 + $0x24c] ss:$16 sps:$4 sm:$0xff]   ;;  %v5158_v13 = vld [vmem:[%s5999_s9 + $0x38] ss:$28 sps:$4 sm:$0xff]   ;;  %v5165_v19 = vld [vmem:[#allocation5 + $0x260] ss:$16 sps:$4 sm:$0xff]  }
  0xba   : > { %2145 = vmatprep.subr.bf16.mxu0 %v5087_v28  ;;  %2597 = vmatprep.subr.bf16.mxu1 %v5089_v29  ;;  %v5162_v15 = vld [vmem:[#allocation5 + $0x248] ss:$16 sps:$4 sm:$0xff]   ;;  %v5167_v16 = vld [vmem:[#allocation5 + $0x264] ss:$16 sps:$4 sm:$0xff]   ;;  %v5170_v17 = vld [vmem:[#allocation5 + $0x26c] ss:$16 sps:$4 sm:$0xff]  }
  0xbb   : > { %v5171_v18 = vld [vmem:[%s5999_s9 + $0x74] ss:$28 sps:$4 sm:$0xff]   ;;  %v5168_v20 = vld [vmem:[#allocation5 + $0x268] ss:$16 sps:$4 sm:$0xff]   ;;  %v5179_v22 = vld [vmem:[#allocation5 + $0x28c] ss:$16 sps:$4 sm:$0xff]  }
  0xbc   : > { %v5176_v21 = vld [vmem:[#allocation5 + $0x284] ss:$16 sps:$4 sm:$0xff]   ;;  %v5173_v23 = vld [vmem:[%s5999_s9 + $0x70] ss:$28 sps:$4 sm:$0xff]   ;;  %v5177_v25 = vld [vmem:[#allocation5 + $0x288] ss:$16 sps:$4 sm:$0xff]  }
  0xbd   : > { %2146 = vmatpush1.bf16.msra.mxu0 %v5091_v30  ;;  %2598 = vmatpush1.bf16.msra.mxu1 %v5092_v31  ;;  %v5174_v24 = vld [vmem:[#allocation5 + $0x280] ss:$16 sps:$4 sm:$0xff]   ;;  %v5182_v26 = vld [vmem:[#allocation5 + $0x2a4] ss:$16 sps:$4 sm:$0xff]   ;;  %v5185_v27 = vld [vmem:[#allocation5 + $0x2ac] ss:$16 sps:$4 sm:$0xff]  }
  0xbe   : > { %2147 = vmatprep.subr.bf16.mxu0 %v5093_v32  ;;  %2599 = vmatprep.subr.bf16.mxu1 %v5095_v33  ;;  %v5186_v28 = vld [vmem:[%s5999_s9 + $0xac] ss:$28 sps:$4 sm:$0xff]   ;;  %v5180_v29 = vld [vmem:[#allocation5 + $0x2a0] ss:$16 sps:$4 sm:$0xff]   ;;  %v5191_v31 = vld [vmem:[#allocation5 + $0x2c4] ss:$16 sps:$4 sm:$0xff]  }
  0xbf   : > { %v5183_v30 = vld [vmem:[#allocation5 + $0x2a8] ss:$16 sps:$4 sm:$0xff]   ;;  %v5194_v32 = vld [vmem:[#allocation5 + $0x2cc] ss:$16 sps:$4 sm:$0xff]   ;;  %s4128_s23 = sshll.u32 %s5995_s20, 7  ;;  %s6291_s29 = sld [smem:[#allocation18_spill]] }
  0xc0   : > { %v5188_v33 = vld [vmem:[%s5999_s9 + $0xa8] ss:$28 sps:$4 sm:$0xff]   ;;  %v5216_v48 = vld [vmem:[%s5999_s9 + $0x11c] ss:$28 sps:$4 sm:$0xff]   ;;  %s6188_s18 = scalar_lea.vmem [#allocation11], %s4128_s23  ;;  %s4465_s22 = sshll.u32 %s5813_s13, 11 }
  0xc1   : > { %2148 = vmatpush1.bf16.msra.mxu0 %v5097_v34  ;;  %2600 = vmatpush1.bf16.msra.mxu1 %v5098_v35  ;;  %v5189_v34 = vld [vmem:[#allocation5 + $0x2c0] ss:$16 sps:$4 sm:$0xff]   ;;  %v5192_v35 = vld [vmem:[#allocation5 + $0x2c8] ss:$16 sps:$4 sm:$0xff]   ;;  %s4002_s19 = sshll.u32 %s6188_s18, 4  ;;  %s6292_s15 = sld [smem:[#allocation19_spill]]  ;;  %s6210_s19 = int_to_ptr.vmem [resolvable:$true] %s4002_s19 }
  0xc2   : > { %2149 = vmatprep.subr.bf16.mxu0 %v5099_v36  ;;  %2601 = vmatprep.subr.bf16.mxu1 %v5101_v37  ;;  %v5197_v36 = vld [vmem:[#allocation5 + $0x2e4] ss:$16 sps:$4 sm:$0xff]   ;;  %v5200_v37 = vld [vmem:[#allocation5 + $0x2ec] ss:$16 sps:$4 sm:$0xff]   ;;  %s3989_s13 = scalar_lea.sflag [#allocation4], %s5995_s20  ;;  %s5651_s21 = scalar_lea.vmem %s6210_s19, 2048 }
  0xc3   : > { %p5652_p8 = scmp.ne.s32.totalorder %s6210_s19, %s5651_s21  ;;  %s5739_s26 = smov [#allocation11]  }
  0xc4   : > { %s5655_s14 = sshll.u32 %s5739_s26, 4  ;;  %s5656_s14 = int_to_ptr.vmem [resolvable:$false] %s5655_s14 }
  0xc5   : > { %2150 = vmatpush1.bf16.msra.mxu0 %v5103_v38  ;;  %2602 = vmatpush1.bf16.msra.mxu1 %v5104_v39  ;;  %v5201_v38 = vld [vmem:[%s5999_s9 + $0xe4] ss:$28 sps:$4 sm:$0xff]   ;;  %p5653_p10 = pnand %p5652_p8, %p5943_p6  ;;  %s5657_s27 = scalar_lea.vmem %s5656_s14, 4096 }
  0xc6   : > { %2151 = vmatprep.subr.bf16.mxu0 %v5105_v40  ;;  %2603 = vmatprep.subr.bf16.mxu1 %v5107_v41  ;;  %v5195_v39 = vld [vmem:[#allocation5 + $0x2e0] ss:$16 sps:$4 sm:$0xff]   ;;  %v5198_v40 = vld [vmem:[#allocation5 + $0x2e8] ss:$16 sps:$4 sm:$0xff]   ;;  %v5206_v41 = vld [vmem:[#allocation5 + $0x304] ss:$16 sps:$4 sm:$0xff]   ;;  %p5658_p3 = scmp.lt.s32.totalorder %s6210_s19, %s5656_s14  ;;  %p5659_p7 = scmp.lt.s32.totalorder %s5657_s27, %s5651_s21 }
  0xc7   : > { %s6208_s17 = scalar_lea.hbm %s6292_s15, %s4465_s22  ;;  %p5654_p12 = pneg %p5653_p10 }
  0xc8   : > { %p5660_p9 = por %p5659_p7, %p5658_p3 }
  0xc9   : > { %2152 = vmatpush1.bf16.msra.mxu0 %v5109_v42  ;;  %2604 = vmatpush1.bf16.msra.mxu1 %v5110_v43  ;;  %v5209_v42 = vld [vmem:[#allocation5 + $0x30c] ss:$16 sps:$4 sm:$0xff]  }
  0xca   : > { %2153 = vmatprep.subr.bf16.mxu0 %v5111_v44  ;;  %2605 = vmatprep.subr.bf16.mxu1 %v5113_v45  ;;  %v5203_v43 = vld [vmem:[%s5999_s9 + $0xe0] ss:$28 sps:$4 sm:$0xff]   ;;  %v5207_v45 = vld [vmem:[#allocation5 + $0x308] ss:$16 sps:$4 sm:$0xff]   ;;  %p5661_p13 = pnand %p5660_p9, %p5654_p12 }
  0xcb   : > { %v5204_v44 = vld [vmem:[#allocation5 + $0x300] ss:$16 sps:$4 sm:$0xff]  }
  0xcd   : > { %2154 = vmatpush1.bf16.msra.mxu0 %v5115_v46  ;;  %2606 = vmatpush1.bf16.msra.mxu1 %v5116_v47  ;;  %v5212_v46 = vld [vmem:[#allocation5 + $0x324] ss:$16 sps:$4 sm:$0xff]   ;;  %v5215_v47 = vld [vmem:[#allocation5 + $0x32c] ss:$16 sps:$4 sm:$0xff]  }
  0xce   : > { %2155 = vmatprep.subr.bf16.mxu0 %v5117_v49  ;;  %2607 = vmatprep.subr.bf16.mxu1 %v5119_v50  ;;  %v5210_v49 = vld [vmem:[#allocation5 + $0x320] ss:$16 sps:$4 sm:$0xff]   ;;  %v5213_v50 = vld [vmem:[#allocation5 + $0x328] ss:$16 sps:$4 sm:$0xff]  }
  0xd1   : > { %2156 = vmatpush1.bf16.msra.mxu0 %v5121_v51  ;;  %2608 = vmatpush1.bf16.msra.mxu1 %v5122_v52  ;;  %v5221_v51 = vld [vmem:[#allocation5 + $0x344] ss:$16 sps:$4 sm:$0xff]   ;;  %v5224_v52 = vld [vmem:[#allocation5 + $0x34c] ss:$16 sps:$4 sm:$0xff]  }
  0xd2   : > { %2157 = vmatprep.subr.bf16.mxu0 %v5123_v53  ;;  %2609 = vmatprep.subr.bf16.mxu1 %v5125_v54  ;;  %v5218_v53 = vld [vmem:[%s5999_s9 + $0x118] ss:$28 sps:$4 sm:$0xff]   ;;  %v5219_v54 = vld [vmem:[#allocation5 + $0x340] ss:$16 sps:$4 sm:$0xff]  }
  0xd5   : > { %2158 = vmatpush1.bf16.msra.mxu0 %v5127_v55  ;;  %2610 = vmatpush1.bf16.msra.mxu1 %v5128_v56  ;;  %v5222_v55 = vld [vmem:[#allocation5 + $0x348] ss:$16 sps:$4 sm:$0xff]   ;;  %v5227_v56 = vld [vmem:[#allocation5 + $0x364] ss:$16 sps:$4 sm:$0xff]  }
  0xd6   : > { %2159 = vmatprep.subr.bf16.mxu0 %v5129_v57  ;;  %2611 = vmatprep.subr.bf16.mxu1 %v5131_v58  ;;  %v5230_v57 = vld [vmem:[#allocation5 + $0x36c] ss:$16 sps:$4 sm:$0xff]   ;;  %v5231_v58 = vld [vmem:[%s5999_s9 + $0x154] ss:$28 sps:$4 sm:$0xff]  }
  0xd9   : > { %2160 = vmatpush1.bf16.msra.mxu0 %v5133_v59  ;;  %2612 = vmatpush1.bf16.msra.mxu1 %v5134_v60  ;;  %v5225_v59 = vld [vmem:[#allocation5 + $0x360] ss:$16 sps:$4 sm:$0xff]   ;;  %v5228_v60 = vld [vmem:[#allocation5 + $0x368] ss:$16 sps:$4 sm:$0xff]  }
  0xda   : > { %2161 = vmatprep.subr.bf16.mxu0 %v5135_v61  ;;  %2613 = vmatprep.subr.bf16.mxu1 %v5137_v62  ;;  %v5236_v61 = vld [vmem:[#allocation5 + $0x384] ss:$16 sps:$4 sm:$0xff]   ;;  %v5239_v62 = vld [vmem:[#allocation5 + $0x38c] ss:$16 sps:$4 sm:$0xff]  }
  0xdd   : > { %2162 = vmatpush1.bf16.msra.mxu0 %v5139_v63  ;;  %2614 = vmatpush1.bf16.msra.mxu1 %v5140_v0  ;;  %v5233_v63 = vld [vmem:[%s5999_s9 + $0x150] ss:$28 sps:$4 sm:$0xff]  }
  0xde   : > { %2244 = vmatprep.subr.bf16.mxu0 %v5146_v1  ;;  %2696 = vmatprep.subr.bf16.mxu1 %v5149_v2  ;;  %v5234_v0 = vld [vmem:[#allocation5 + $0x380] ss:$16 sps:$4 sm:$0xff]   ;;  %v5237_v1 = vld [vmem:[#allocation5 + $0x388] ss:$16 sps:$4 sm:$0xff]   ;;  %v5242_v2 = vld [vmem:[#allocation5 + $0x3a4] ss:$16 sps:$4 sm:$0xff]  }
  0xe0   : > { %2164 = vmatmul.mubr.bf16.vlgmr.msra.gmra.mrb[0].mxu0 %v5141_v3  ;;  %2616 = vmatmul.mubr.bf16.vlgmr.msra.gmra.mrb[0].mxu1 %v5141_v3  ;;  %v5245_v3 = vld [vmem:[#allocation5 + $0x3ac] ss:$16 sps:$4 sm:$0xff]  }
  0xe1   : > { %2245 = vmatpush1.bf16.msra.mxu0 %v5144_v4  ;;  %2697 = vmatpush1.bf16.msra.mxu1 %v5147_v5  ;;  %v5246_v4 = vld [vmem:[%s5999_s9 + $0x18c] ss:$28 sps:$4 sm:$0xff]   ;;  %v5240_v5 = vld [vmem:[#allocation5 + $0x3a0] ss:$16 sps:$4 sm:$0xff]  }
  0xe2   : > { %2246 = vmatprep.subr.bf16.mxu0 %v5152_v6  ;;  %2698 = vmatprep.subr.bf16.mxu1 %v5155_v7  ;;  %v5243_v6 = vld [vmem:[#allocation5 + $0x3a8] ss:$16 sps:$4 sm:$0xff]   ;;  %v5251_v7 = vld [vmem:[#allocation5 + $0x3c4] ss:$16 sps:$4 sm:$0xff]  }
  0xe3   : > { %2173 = vmatprep.mubr.bf16.mxu0 %v5156_v8  ;;  %2625 = vmatprep.mubr.bf16.mxu1 %v5156_v8  ;;  %v5254_v8 = vld [vmem:[#allocation5 + $0x3cc] ss:$16 sps:$4 sm:$0xff]  }
  0xe5   : > { %2247 = vmatpush1.bf16.msra.mxu0 %v5150_v9  ;;  %2699 = vmatpush1.bf16.msra.mxu1 %v5153_v10  ;;  %v5248_v9 = vld [vmem:[%s5999_s9 + $0x188] ss:$28 sps:$4 sm:$0xff]   ;;  %v5249_v10 = vld [vmem:[#allocation5 + $0x3c0] ss:$16 sps:$4 sm:$0xff]  }
  0xe6   : > { %2248 = vmatprep.subr.bf16.mxu0 %v5161_v11  ;;  %2700 = vmatprep.subr.bf16.mxu1 %v5164_v12  ;;  %v5252_v11 = vld [vmem:[#allocation5 + $0x3c8] ss:$16 sps:$4 sm:$0xff]   ;;  %v5257_v12 = vld [vmem:[#allocation5 + $0x3e4] ss:$16 sps:$4 sm:$0xff]  }
  0xe8   : > { %2174 = vmatmul.mubr.bf16.gmra.mrb[4].mxu0 %v5158_v13  ;;  %2626 = vmatmul.mubr.bf16.gmra.mrb[4].mxu1 %v5158_v13  ;;  %v5260_v13 = vld [vmem:[#allocation5 + $0x3ec] ss:$16 sps:$4 sm:$0xff]  }
  0xe9   : > { %2249 = vmatpush1.bf16.msra.mxu0 %v5159_v14  ;;  %2701 = vmatpush1.bf16.msra.mxu1 %v5162_v15  ;;  %v5263_v14 = vld [vmem:[%s5999_s9 + $0xc] ss:$28 sps:$4 sm:$0xff]   ;;  %v5255_v15 = vld [vmem:[#allocation5 + $0x3e0] ss:$16 sps:$4 sm:$0xff]  }
  0xea   : > { %2250 = vmatprep.subr.bf16.mxu0 %v5167_v16  ;;  %2702 = vmatprep.subr.bf16.mxu1 %v5170_v17  ;;  %v5258_v16 = vld [vmem:[#allocation5 + $0x3e8] ss:$16 sps:$4 sm:$0xff]   ;;  %v5266_v17 = vld [vmem:[#allocation5 + $0x404] ss:$16 sps:$4 sm:$0xff]  }
  0xeb   : > { %2183 = vmatprep.mubr.bf16.mxu0 %v5171_v18  ;;  %2635 = vmatprep.mubr.bf16.mxu1 %v5171_v18  ;;  %v5269_v18 = vld [vmem:[#allocation5 + $0x40c] ss:$16 sps:$4 sm:$0xff]  }
  0xed   : > { %2251 = vmatpush1.bf16.msra.mxu0 %v5165_v19  ;;  %2703 = vmatpush1.bf16.msra.mxu1 %v5168_v20  ;;  %v5261_v19 = vld [vmem:[%s5999_s9 + $0x8] ss:$28 sps:$4 sm:$0xff]   ;;  %v5264_v20 = vld [vmem:[#allocation5 + $0x400] ss:$16 sps:$4 sm:$0xff]  }
  0xee   : > { %2252 = vmatprep.subr.bf16.mxu0 %v5176_v21  ;;  %2704 = vmatprep.subr.bf16.mxu1 %v5179_v22  ;;  %v5267_v21 = vld [vmem:[#allocation5 + $0x408] ss:$16 sps:$4 sm:$0xff]   ;;  %v5272_v22 = vld [vmem:[#allocation5 + $0x424] ss:$16 sps:$4 sm:$0xff]  }
  0xf0   : > { %2184 = vmatmul.mubr.bf16.gmra.mrb[8].mxu0 %v5173_v23  ;;  %2636 = vmatmul.mubr.bf16.gmra.mrb[8].mxu1 %v5173_v23  ;;  %v5275_v23 = vld [vmem:[#allocation5 + $0x42c] ss:$16 sps:$4 sm:$0xff]  }
  0xf1   : > { %2253 = vmatpush1.bf16.msra.mxu0 %v5174_v24  ;;  %2705 = vmatpush1.bf16.msra.mxu1 %v5177_v25  ;;  %v5276_v24 = vld [vmem:[%s5999_s9 + $0x44] ss:$28 sps:$4 sm:$0xff]  }
  0xf2   : > { %2254 = vmatprep.subr.bf16.mxu0 %v5182_v26  ;;  %2706 = vmatprep.subr.bf16.mxu1 %v5185_v27  ;;  %v5270_v25 = vld [vmem:[#allocation5 + $0x420] ss:$16 sps:$4 sm:$0xff]   ;;  %v5273_v26 = vld [vmem:[#allocation5 + $0x428] ss:$16 sps:$4 sm:$0xff]   ;;  %v5281_v27 = vld [vmem:[#allocation5 + $0x444] ss:$16 sps:$4 sm:$0xff]  }
  0xf3   : > { %2193 = vmatprep.mubr.bf16.mxu0 %v5186_v28  ;;  %2645 = vmatprep.mubr.bf16.mxu1 %v5186_v28  ;;  %v5284_v28 = vld [vmem:[#allocation5 + $0x44c] ss:$16 sps:$4 sm:$0xff]  }
  0xf5   : > { %2255 = vmatpush1.bf16.msra.mxu0 %v5180_v29  ;;  %2707 = vmatpush1.bf16.msra.mxu1 %v5183_v30  ;;  %v5278_v29 = vld [vmem:[%s5999_s9 + $0x40] ss:$28 sps:$4 sm:$0xff]  }
  0xf6   : > { %2256 = vmatprep.subr.bf16.mxu0 %v5191_v31  ;;  %2708 = vmatprep.subr.bf16.mxu1 %v5194_v32  ;;  %v5279_v30 = vld [vmem:[#allocation5 + $0x440] ss:$16 sps:$4 sm:$0xff]   ;;  %v5282_v31 = vld [vmem:[#allocation5 + $0x448] ss:$16 sps:$4 sm:$0xff]   ;;  %v5287_v32 = vld [vmem:[#allocation5 + $0x464] ss:$16 sps:$4 sm:$0xff]  }
  0xf8   : > { %2194 = vmatmul.mubr.bf16.gmra.mrb[12].mxu0 %v5188_v33  ;;  %2646 = vmatmul.mubr.bf16.gmra.mrb[12].mxu1 %v5188_v33  ;;  %v5290_v33 = vld [vmem:[#allocation5 + $0x46c] ss:$16 sps:$4 sm:$0xff]  }
  0xf9   : > { %2257 = vmatpush1.bf16.msra.mxu0 %v5189_v34  ;;  %2709 = vmatpush1.bf16.msra.mxu1 %v5192_v35  ;;  %v5291_v34 = vld [vmem:[%s5999_s9 + $0x7c] ss:$28 sps:$4 sm:$0xff]   ;;  %v5285_v35 = vld [vmem:[#allocation5 + $0x460] ss:$16 sps:$4 sm:$0xff]  }
  0xfa   : > { %2258 = vmatprep.subr.bf16.mxu0 %v5197_v36  ;;  %2710 = vmatprep.subr.bf16.mxu1 %v5200_v37  ;;  %v5288_v36 = vld [vmem:[#allocation5 + $0x468] ss:$16 sps:$4 sm:$0xff]   ;;  %v5296_v37 = vld [vmem:[#allocation5 + $0x484] ss:$16 sps:$4 sm:$0xff]  }
  0xfb   : > { %2203 = vmatprep.mubr.bf16.mxu0 %v5201_v38  ;;  %2655 = vmatprep.mubr.bf16.mxu1 %v5201_v38  ;;  %v5299_v38 = vld [vmem:[#allocation5 + $0x48c] ss:$16 sps:$4 sm:$0xff]  }
  0xfd   : > { %2259 = vmatpush1.bf16.msra.mxu0 %v5195_v39  ;;  %2711 = vmatpush1.bf16.msra.mxu1 %v5198_v40  ;;  %v5293_v39 = vld [vmem:[%s5999_s9 + $0x78] ss:$28 sps:$4 sm:$0xff]   ;;  %v5294_v40 = vld [vmem:[#allocation5 + $0x480] ss:$16 sps:$4 sm:$0xff]  }
  0xfe   : > { %2260 = vmatprep.subr.bf16.mxu0 %v5206_v41  ;;  %2712 = vmatprep.subr.bf16.mxu1 %v5209_v42  ;;  %v5297_v41 = vld [vmem:[#allocation5 + $0x488] ss:$16 sps:$4 sm:$0xff]   ;;  %v5302_v42 = vld [vmem:[#allocation5 + $0x4a4] ss:$16 sps:$4 sm:$0xff]  }
 0x100   : > { %2204 = vmatmul.mubr.bf16.gmra.mrb[16].mxu0 %v5203_v43  ;;  %2656 = vmatmul.mubr.bf16.gmra.mrb[16].mxu1 %v5203_v43  ;;  %v5305_v43 = vld [vmem:[#allocation5 + $0x4ac] ss:$16 sps:$4 sm:$0xff]  }
 0x101   : > { %2261 = vmatpush1.bf16.msra.mxu0 %v5204_v44  ;;  %2713 = vmatpush1.bf16.msra.mxu1 %v5207_v45  ;;  %v5306_v44 = vld [vmem:[%s5999_s9 + $0xb4] ss:$28 sps:$4 sm:$0xff]  }
 0x102   : > { %2262 = vmatprep.subr.bf16.mxu0 %v5212_v46  ;;  %2714 = vmatprep.subr.bf16.mxu1 %v5215_v47  ;;  %v5300_v45 = vld [vmem:[#allocation5 + $0x4a0] ss:$16 sps:$4 sm:$0xff]   ;;  %v5303_v46 = vld [vmem:[#allocation5 + $0x4a8] ss:$16 sps:$4 sm:$0xff]   ;;  %v5311_v47 = vld [vmem:[#allocation5 + $0x4c4] ss:$16 sps:$4 sm:$0xff]  }
 0x103   : > { %2213 = vmatprep.mubr.bf16.mxu0 %v5216_v48  ;;  %2665 = vmatprep.mubr.bf16.mxu1 %v5216_v48  ;;  %v5314_v48 = vld [vmem:[#allocation5 + $0x4cc] ss:$16 sps:$4 sm:$0xff]  }
 0x105   : > { %2263 = vmatpush1.bf16.msra.mxu0 %v5210_v49  ;;  %2715 = vmatpush1.bf16.msra.mxu1 %v5213_v50  ;;  %v5308_v49 = vld [vmem:[%s5999_s9 + $0xb0] ss:$28 sps:$4 sm:$0xff]  }
 0x106   : > { %2264 = vmatprep.subr.bf16.mxu0 %v5221_v51  ;;  %2716 = vmatprep.subr.bf16.mxu1 %v5224_v52  ;;  %v5309_v50 = vld [vmem:[#allocation5 + $0x4c0] ss:$16 sps:$4 sm:$0xff]   ;;  %v5312_v51 = vld [vmem:[#allocation5 + $0x4c8] ss:$16 sps:$4 sm:$0xff]   ;;  %v5317_v52 = vld [vmem:[#allocation5 + $0x4e4] ss:$16 sps:$4 sm:$0xff]  }
 0x108   : > { %2214 = vmatmul.mubr.bf16.gmra.mrb[20].mxu0 %v5218_v53  ;;  %2666 = vmatmul.mubr.bf16.gmra.mrb[20].mxu1 %v5218_v53  ;;  %v5320_v53 = vld [vmem:[#allocation5 + $0x4ec] ss:$16 sps:$4 sm:$0xff]  }
 0x109   : > { %2265 = vmatpush1.bf16.msra.mxu0 %v5219_v54  ;;  %2717 = vmatpush1.bf16.msra.mxu1 %v5222_v55  ;;  %v5321_v54 = vld [vmem:[%s5999_s9 + $0xec] ss:$28 sps:$4 sm:$0xff]   ;;  %v5315_v55 = vld [vmem:[#allocation5 + $0x4e0] ss:$16 sps:$4 sm:$0xff]  }
 0x10a   : > { %2266 = vmatprep.subr.bf16.mxu0 %v5227_v56  ;;  %2718 = vmatprep.subr.bf16.mxu1 %v5230_v57  ;;  %v5318_v56 = vld [vmem:[#allocation5 + $0x4e8] ss:$16 sps:$4 sm:$0xff]   ;;  %v5326_v57 = vld [vmem:[#allocation5 + $0x504] ss:$16 sps:$4 sm:$0xff]  }
 0x10b   : > { %2223 = vmatprep.mubr.bf16.mxu0 %v5231_v58  ;;  %2675 = vmatprep.mubr.bf16.mxu1 %v5231_v58  ;;  %v5329_v58 = vld [vmem:[#allocation5 + $0x50c] ss:$16 sps:$4 sm:$0xff]  }
 0x10d   : > { %2267 = vmatpush1.bf16.msra.mxu0 %v5225_v59  ;;  %2719 = vmatpush1.bf16.msra.mxu1 %v5228_v60  ;;  %v5323_v59 = vld [vmem:[%s5999_s9 + $0xe8] ss:$28 sps:$4 sm:$0xff]   ;;  %v5324_v60 = vld [vmem:[#allocation5 + $0x500] ss:$16 sps:$4 sm:$0xff]  }
 0x10e   : > { %2268 = vmatprep.subr.bf16.mxu0 %v5236_v61  ;;  %2720 = vmatprep.subr.bf16.mxu1 %v5239_v62  ;;  %v5327_v61 = vld [vmem:[#allocation5 + $0x508] ss:$16 sps:$4 sm:$0xff]   ;;  %v5332_v62 = vld [vmem:[#allocation5 + $0x524] ss:$16 sps:$4 sm:$0xff]  }
 0x110   : > { %2224 = vmatmul.mubr.bf16.gmra.mrb[24].mxu0 %v5233_v63  ;;  %2676 = vmatmul.mubr.bf16.gmra.mrb[24].mxu1 %v5233_v63  ;;  %v5335_v63 = vld [vmem:[#allocation5 + $0x52c] ss:$16 sps:$4 sm:$0xff]  }
 0x111   : > { %2269 = vmatpush1.bf16.msra.mxu0 %v5234_v0  ;;  %2721 = vmatpush1.bf16.msra.mxu1 %v5237_v1  ;;  %v5336_v0 = vld [vmem:[%s5999_s9 + $0x124] ss:$28 sps:$4 sm:$0xff]  }
 0x112   : > { %2270 = vmatprep.subr.bf16.mxu0 %v5242_v2  ;;  %2722 = vmatprep.subr.bf16.mxu1 %v5245_v3  ;;  %v5330_v1 = vld [vmem:[#allocation5 + $0x520] ss:$16 sps:$4 sm:$0xff]   ;;  %v5333_v2 = vld [vmem:[#allocation5 + $0x528] ss:$16 sps:$4 sm:$0xff]   ;;  %v5341_v3 = vld [vmem:[#allocation5 + $0x544] ss:$16 sps:$4 sm:$0xff]  }
 0x113   : > { %2233 = vmatprep.mubr.bf16.mxu0 %v5246_v4  ;;  %2685 = vmatprep.mubr.bf16.mxu1 %v5246_v4  ;;  %v5344_v4 = vld [vmem:[#allocation5 + $0x54c] ss:$16 sps:$4 sm:$0xff]  }
 0x115   : > { %2271 = vmatpush1.bf16.msra.mxu0 %v5240_v5  ;;  %2723 = vmatpush1.bf16.msra.mxu1 %v5243_v6  ;;  %v5338_v5 = vld [vmem:[%s5999_s9 + $0x120] ss:$28 sps:$4 sm:$0xff]  }
 0x116   : > { %2272 = vmatprep.subr.bf16.mxu0 %v5251_v7  ;;  %2724 = vmatprep.subr.bf16.mxu1 %v5254_v8  ;;  %v5339_v6 = vld [vmem:[#allocation5 + $0x540] ss:$16 sps:$4 sm:$0xff]   ;;  %v5342_v7 = vld [vmem:[#allocation5 + $0x548] ss:$16 sps:$4 sm:$0xff]   ;;  %v5347_v8 = vld [vmem:[#allocation5 + $0x564] ss:$16 sps:$4 sm:$0xff]  }
 0x118   : > { %2234 = vmatmul.mubr.bf16.gmra.mrb[28].mxu0 %v5248_v9  ;;  %2686 = vmatmul.mubr.bf16.gmra.mrb[28].mxu1 %v5248_v9  ;;  %v5350_v9 = vld [vmem:[#allocation5 + $0x56c] ss:$16 sps:$4 sm:$0xff]  }
 0x119   : > { %2273 = vmatpush1.bf16.msra.mxu0 %v5249_v10  ;;  %2725 = vmatpush1.bf16.msra.mxu1 %v5252_v11  ;;  %v5351_v10 = vld [vmem:[%s5999_s9 + $0x15c] ss:$28 sps:$4 sm:$0xff]   ;;  %v5345_v11 = vld [vmem:[#allocation5 + $0x560] ss:$16 sps:$4 sm:$0xff]  }
 0x11a   : > { %2274 = vmatprep.subr.bf16.mxu0 %v5257_v12  ;;  %2726 = vmatprep.subr.bf16.mxu1 %v5260_v13  ;;  %v5348_v12 = vld [vmem:[#allocation5 + $0x568] ss:$16 sps:$4 sm:$0xff]   ;;  %v5356_v13 = vld [vmem:[#allocation5 + $0x584] ss:$16 sps:$4 sm:$0xff]  }
 0x11b   : > { %2276 = vmatprep.mubr.bf16.mxu0 %v5263_v14  ;;  %2728 = vmatprep.mubr.bf16.mxu1 %v5263_v14  ;;  %v5359_v14 = vld [vmem:[#allocation5 + $0x58c] ss:$16 sps:$4 sm:$0xff]  }
 0x11d   : > { %2275 = vmatpush1.bf16.msra.mxu0 %v5255_v15  ;;  %2727 = vmatpush1.bf16.msra.mxu1 %v5258_v16  ;;  %v5353_v15 = vld [vmem:[%s5999_s9 + $0x158] ss:$28 sps:$4 sm:$0xff]   ;;  %v5354_v16 = vld [vmem:[#allocation5 + $0x580] ss:$16 sps:$4 sm:$0xff]  }
 0x11e   : > { %2357 = vmatprep.subr.bf16.mxu0 %v5266_v17  ;;  %2809 = vmatprep.subr.bf16.mxu1 %v5269_v18  ;;  %v5357_v17 = vld [vmem:[#allocation5 + $0x588] ss:$16 sps:$4 sm:$0xff]   ;;  %v5362_v18 = vld [vmem:[#allocation5 + $0x5a4] ss:$16 sps:$4 sm:$0xff]  }
 0x120   : > { %2277 = vmatmul.mubr.bf16.vlgmr.msra.gmra.mrb[0].mxu0 %v5261_v19  ;;  %2729 = vmatmul.mubr.bf16.vlgmr.msra.gmra.mrb[0].mxu1 %v5261_v19  ;;  %v5365_v19 = vld [vmem:[#allocation5 + $0x5ac] ss:$16 sps:$4 sm:$0xff]  }
 0x121   : > { %2358 = vmatpush1.bf16.msra.mxu0 %v5264_v20  ;;  %2810 = vmatpush1.bf16.msra.mxu1 %v5267_v21  ;;  %v5366_v20 = vld [vmem:[%s5999_s9 + $0x194] ss:$28 sps:$4 sm:$0xff]  }
 0x122   : > { %2359 = vmatprep.subr.bf16.mxu0 %v5272_v22  ;;  %2811 = vmatprep.subr.bf16.mxu1 %v5275_v23  ;;  %v5360_v21 = vld [vmem:[#allocation5 + $0x5a0] ss:$16 sps:$4 sm:$0xff]   ;;  %v5363_v22 = vld [vmem:[#allocation5 + $0x5a8] ss:$16 sps:$4 sm:$0xff]   ;;  %v5371_v23 = vld [vmem:[#allocation5 + $0x5c4] ss:$16 sps:$4 sm:$0xff]  }
 0x123   : > { %2286 = vmatprep.mubr.bf16.mxu0 %v5276_v24  ;;  %2738 = vmatprep.mubr.bf16.mxu1 %v5276_v24  ;;  %v5368_v24 = vld [vmem:[%s5999_s9 + $0x190] ss:$28 sps:$4 sm:$0xff]  }
 0x125   : > { %2360 = vmatpush1.bf16.msra.mxu0 %v5270_v25  ;;  %2812 = vmatpush1.bf16.msra.mxu1 %v5273_v26  ;;  %v5374_v25 = vld [vmem:[#allocation5 + $0x5cc] ss:$16 sps:$4 sm:$0xff]   ;;  %v5369_v26 = vld [vmem:[#allocation5 + $0x5c0] ss:$16 sps:$4 sm:$0xff]  }
 0x126   : > { %2361 = vmatprep.subr.bf16.mxu0 %v5281_v27  ;;  %2813 = vmatprep.subr.bf16.mxu1 %v5284_v28  ;;  %v5372_v27 = vld [vmem:[#allocation5 + $0x5c8] ss:$16 sps:$4 sm:$0xff]   ;;  %v5377_v28 = vld [vmem:[#allocation5 + $0x5e4] ss:$16 sps:$4 sm:$0xff]  }
 0x128   : > { %2287 = vmatmul.mubr.bf16.gmra.mrb[4].mxu0 %v5278_v29  ;;  %2739 = vmatmul.mubr.bf16.gmra.mrb[4].mxu1 %v5278_v29  ;;  %v5380_v29 = vld [vmem:[#allocation5 + $0x5ec] ss:$16 sps:$4 sm:$0xff]  }
 0x129   : > { %2362 = vmatpush1.bf16.msra.mxu0 %v5279_v30  ;;  %2814 = vmatpush1.bf16.msra.mxu1 %v5282_v31  ;;  %v5375_v30 = vld [vmem:[#allocation5 + $0x5e0] ss:$16 sps:$4 sm:$0xff]  }
 0x12a   : > { %2363 = vmatprep.subr.bf16.mxu0 %v5287_v32  ;;  %2815 = vmatprep.subr.bf16.mxu1 %v5290_v33  ;;  %v5383_v31 = vld [vmem:[%s5999_s9 + $0x14] ss:$28 sps:$4 sm:$0xff]   ;;  %v5378_v32 = vld [vmem:[#allocation5 + $0x5e8] ss:$16 sps:$4 sm:$0xff]  }
 0x12b   : > { %2296 = vmatprep.mubr.bf16.mxu0 %v5291_v34  ;;  %2748 = vmatprep.mubr.bf16.mxu1 %v5291_v34  ;;  %v5386_v33 = vld [vmem:[#allocation5 + $0x604] ss:$16 sps:$4 sm:$0xff]   ;;  %v5381_v34 = vld [vmem:[%s5999_s9 + $0x10] ss:$28 sps:$4 sm:$0xff]  }
 0x12d   : > { %2364 = vmatpush1.bf16.msra.mxu0 %v5285_v35  ;;  %2816 = vmatpush1.bf16.msra.mxu1 %v5288_v36  ;;  %v5389_v35 = vld [vmem:[#allocation5 + $0x60c] ss:$16 sps:$4 sm:$0xff]   ;;  %v5384_v36 = vld [vmem:[#allocation5 + $0x600] ss:$16 sps:$4 sm:$0xff]  }
 0x12e   : > { %2365 = vmatprep.subr.bf16.mxu0 %v5296_v37  ;;  %2817 = vmatprep.subr.bf16.mxu1 %v5299_v38  ;;  %v5387_v37 = vld [vmem:[#allocation5 + $0x608] ss:$16 sps:$4 sm:$0xff]  }
 0x12f   : > { %v5390_v38 = vld [vmem:[%s5999_s9 + $0x4c] ss:$28 sps:$4 sm:$0xff]  }
 0x130   : > { %2297 = vmatmul.mubr.bf16.gmra.mrb[8].mxu0 %v5293_v39  ;;  %2749 = vmatmul.mubr.bf16.gmra.mrb[8].mxu1 %v5293_v39  ;;  %v5395_v39 = vld [vmem:[#allocation5 + $0x624] ss:$16 sps:$4 sm:$0xff]  }
 0x131   : > { %2366 = vmatpush1.bf16.msra.mxu0 %v5294_v40  ;;  %2818 = vmatpush1.bf16.msra.mxu1 %v5297_v41  ;;  %v5393_v40 = vld [vmem:[#allocation5 + $0x620] ss:$16 sps:$4 sm:$0xff]   ;;  %v5398_v41 = vld [vmem:[#allocation5 + $0x62c] ss:$16 sps:$4 sm:$0xff]  }
 0x132   : > { %2367 = vmatprep.subr.bf16.mxu0 %v5302_v42  ;;  %2819 = vmatprep.subr.bf16.mxu1 %v5305_v43  ;;  %v5396_v42 = vld [vmem:[#allocation5 + $0x628] ss:$16 sps:$4 sm:$0xff]   ;;  %v5404_v43 = vld [vmem:[#allocation5 + $0x644] ss:$16 sps:$4 sm:$0xff]  }
 0x133   : > { %2306 = vmatprep.mubr.bf16.mxu0 %v5306_v44  ;;  %2758 = vmatprep.mubr.bf16.mxu1 %v5306_v44  ;;  %v5392_v44 = vld [vmem:[%s5999_s9 + $0x48] ss:$28 sps:$4 sm:$0xff]  }
 0x135   : > { %2368 = vmatpush1.bf16.msra.mxu0 %v5300_v45  ;;  %2820 = vmatpush1.bf16.msra.mxu1 %v5303_v46  ;;  %v5407_v45 = vld [vmem:[#allocation5 + $0x64c] ss:$16 sps:$4 sm:$0xff]   ;;  %v5399_v46 = vld [vmem:[%s5999_s9 + $0x84] ss:$28 sps:$4 sm:$0xff]  }
 0x136   : > { %2369 = vmatprep.subr.bf16.mxu0 %v5311_v47  ;;  %2821 = vmatprep.subr.bf16.mxu1 %v5314_v48  ;;  %v5402_v47 = vld [vmem:[#allocation5 + $0x640] ss:$16 sps:$4 sm:$0xff]   ;;  %v5405_v48 = vld [vmem:[#allocation5 + $0x648] ss:$16 sps:$4 sm:$0xff]  }
 0x138   : > { %2307 = vmatmul.mubr.bf16.gmra.mrb[12].mxu0 %v5308_v49  ;;  %2759 = vmatmul.mubr.bf16.gmra.mrb[12].mxu1 %v5308_v49  ;;  %v5413_v49 = vld [vmem:[#allocation5 + $0x664] ss:$16 sps:$4 sm:$0xff]  }
 0x139   : > { %2370 = vmatpush1.bf16.msra.mxu0 %v5309_v50  ;;  %2822 = vmatpush1.bf16.msra.mxu1 %v5312_v51  ;;  %v5416_v50 = vld [vmem:[#allocation5 + $0x66c] ss:$16 sps:$4 sm:$0xff]   ;;  %v5411_v51 = vld [vmem:[#allocation5 + $0x660] ss:$16 sps:$4 sm:$0xff]  }
 0x13a   : > { %2371 = vmatprep.subr.bf16.mxu0 %v5317_v52  ;;  %2823 = vmatprep.subr.bf16.mxu1 %v5320_v53  ;;  %v5414_v52 = vld [vmem:[#allocation5 + $0x668] ss:$16 sps:$4 sm:$0xff]   ;;  %v5401_v53 = vld [vmem:[%s5999_s9 + $0x80] ss:$28 sps:$4 sm:$0xff]  }
 0x13b   : > { %2316 = vmatprep.mubr.bf16.mxu0 %v5321_v54  ;;  %2768 = vmatprep.mubr.bf16.mxu1 %v5321_v54  ;;  %v5422_v54 = vld [vmem:[#allocation5 + $0x684] ss:$16 sps:$4 sm:$0xff]  }
 0x13d   : > { %2372 = vmatpush1.bf16.msra.mxu0 %v5315_v55  ;;  %2824 = vmatpush1.bf16.msra.mxu1 %v5318_v56  ;;  %v5408_v55 = vld [vmem:[%s5999_s9 + $0xbc] ss:$28 sps:$4 sm:$0xff]  }
 0x13e   : > { %2373 = vmatprep.subr.bf16.mxu0 %v5326_v57  ;;  %2825 = vmatprep.subr.bf16.mxu1 %v5329_v58  ;;  %v5425_v56 = vld [vmem:[#allocation5 + $0x68c] ss:$16 sps:$4 sm:$0xff]   ;;  %v5420_v57 = vld [vmem:[#allocation5 + $0x680] ss:$16 sps:$4 sm:$0xff]   ;;  %v5423_v58 = vld [vmem:[#allocation5 + $0x688] ss:$16 sps:$4 sm:$0xff]  }
 0x140   : > { %2317 = vmatmul.mubr.bf16.gmra.mrb[16].mxu0 %v5323_v59  ;;  %2769 = vmatmul.mubr.bf16.gmra.mrb[16].mxu1 %v5323_v59  ;;  %v5431_v59 = vld [vmem:[#allocation5 + $0x6a4] ss:$16 sps:$4 sm:$0xff]  }
 0x141   : > { %2374 = vmatpush1.bf16.msra.mxu0 %v5324_v60  ;;  %2826 = vmatpush1.bf16.msra.mxu1 %v5327_v61  ;;  %v5434_v60 = vld [vmem:[#allocation5 + $0x6ac] ss:$16 sps:$4 sm:$0xff]   ;;  %v5429_v61 = vld [vmem:[#allocation5 + $0x6a0] ss:$16 sps:$4 sm:$0xff]  }
 0x142   : > { %2375 = vmatprep.subr.bf16.mxu0 %v5332_v62  ;;  %2827 = vmatprep.subr.bf16.mxu1 %v5335_v63  ;;  %v5432_v62 = vld [vmem:[#allocation5 + $0x6a8] ss:$16 sps:$4 sm:$0xff]  }
 0x143   : > { %2326 = vmatprep.mubr.bf16.mxu0 %v5336_v0  ;;  %2778 = vmatprep.mubr.bf16.mxu1 %v5336_v0  ;;  %v5410_v63 = vld [vmem:[%s5999_s9 + $0xb8] ss:$28 sps:$4 sm:$0xff]  }
 0x144   : > { %v5440_v0 = vld [vmem:[#allocation5 + $0x6c4] ss:$16 sps:$4 sm:$0xff]  }
 0x145   : > { %2376 = vmatpush1.bf16.msra.mxu0 %v5330_v1  ;;  %2828 = vmatpush1.bf16.msra.mxu1 %v5333_v2  ;;  %v5417_v1 = vld [vmem:[%s5999_s9 + $0xf4] ss:$28 sps:$4 sm:$0xff]   ;;  %v5443_v2 = vld [vmem:[#allocation5 + $0x6cc] ss:$16 sps:$4 sm:$0xff]  }
 0x146   : > { %2377 = vmatprep.subr.bf16.mxu0 %v5341_v3  ;;  %2829 = vmatprep.subr.bf16.mxu1 %v5344_v4  ;;  %v5438_v3 = vld [vmem:[#allocation5 + $0x6c0] ss:$16 sps:$4 sm:$0xff]   ;;  %v5441_v4 = vld [vmem:[#allocation5 + $0x6c8] ss:$16 sps:$4 sm:$0xff]  }
 0x148   : > { %2327 = vmatmul.mubr.bf16.gmra.mrb[20].mxu0 %v5338_v5  ;;  %2779 = vmatmul.mubr.bf16.gmra.mrb[20].mxu1 %v5338_v5  ;;  %v5449_v5 = vld [vmem:[#allocation5 + $0x6e4] ss:$16 sps:$4 sm:$0xff]  }
 0x149   : > { %2378 = vmatpush1.bf16.msra.mxu0 %v5339_v6  ;;  %2830 = vmatpush1.bf16.msra.mxu1 %v5342_v7  ;;  %v5452_v6 = vld [vmem:[#allocation5 + $0x6ec] ss:$16 sps:$4 sm:$0xff]   ;;  %v5447_v7 = vld [vmem:[#allocation5 + $0x6e0] ss:$16 sps:$4 sm:$0xff]  }
 0x14a   : > { %2379 = vmatprep.subr.bf16.mxu0 %v5347_v8  ;;  %2831 = vmatprep.subr.bf16.mxu1 %v5350_v9  ;;  %v5450_v8 = vld [vmem:[#allocation5 + $0x6e8] ss:$16 sps:$4 sm:$0xff]   ;;  %v5461_v9 = vld [vmem:[#allocation7 + $0x40] sm:$0xff]  }
 0x14b   : > { %2336 = vmatprep.mubr.bf16.mxu0 %v5351_v10  ;;  %2788 = vmatprep.mubr.bf16.mxu1 %v5351_v10  ;;  %v5463_v10 = vld [vmem:[#allocation7 + $0xc0] sm:$0xff]  }
 0x14d   : > { %2380 = vmatpush1.bf16.msra.mxu0 %v5345_v11  ;;  %2832 = vmatpush1.bf16.msra.mxu1 %v5348_v12  ;;  %v5419_v11 = vld [vmem:[%s5999_s9 + $0xf0] ss:$28 sps:$4 sm:$0xff]  }
 0x14e   : > { %2381 = vmatprep.subr.bf16.mxu0 %v5356_v13  ;;  %2833 = vmatprep.subr.bf16.mxu1 %v5359_v14  ;;  %v5426_v12 = vld [vmem:[%s5999_s9 + $0x12c] ss:$28 sps:$4 sm:$0xff]   ;;  %v5435_v14 = vld [vmem:[%s5999_s9 + $0x164] ss:$28 sps:$4 sm:$0xff]  }
 0x14f   : > { %v5428_v13 = vld [vmem:[%s5999_s9 + $0x128] ss:$28 sps:$4 sm:$0xff]  }
 0x150   : > { %2337 = vmatmul.mubr.bf16.gmra.mrb[24].mxu0 %v5353_v15  ;;  %2789 = vmatmul.mubr.bf16.gmra.mrb[24].mxu1 %v5353_v15  ;;  %v5437_v15 = vld [vmem:[%s5999_s9 + $0x160] ss:$28 sps:$4 sm:$0xff]  }
 0x151   : > { %2382 = vmatpush1.bf16.msra.mxu0 %v5354_v16  ;;  %2834 = vmatpush1.bf16.msra.mxu1 %v5357_v17  ;;  %v5444_v16 = vld [vmem:[%s5999_s9 + $0x19c] ss:$28 sps:$4 sm:$0xff]  }
 0x152   : > { %2383 = vmatprep.subr.bf16.mxu0 %v5362_v18  ;;  %2835 = vmatprep.subr.bf16.mxu1 %v5365_v19  ;;  %v5446_v17 = vld [vmem:[%s5999_s9 + $0x198] ss:$28 sps:$4 sm:$0xff]   ;;  %v5738_v18 = vmov 0  }
 0x153   : > { %2346 = vmatprep.mubr.bf16.mxu0 %v5366_v20  ;;  %2798 = vmatprep.mubr.bf16.mxu1 %v5366_v20  ;;  %v5453_v19 = vld [vmem:[%s5999_s9 + $0x18] ss:$28 sps:$4 sm:$0xff]   ;;  %v5462_v20 = vld [vmem:[#allocation7] sm:$0xff]  }
 0x155   : > { %2384 = vmatpush1.bf16.msra.mxu0 %v5360_v21  ;;  %2836 = vmatpush1.bf16.msra.mxu1 %v5363_v22  ;;  %v5464_v21 = vld [vmem:[#allocation7 + $0x80] sm:$0xff]   ;;  %v5465_v22 = vld [vmem:[#allocation7 + $0x48] sm:$0xff]  }
 0x156   : > { %2385 = vmatprep.subr.bf16.mxu0 %v5371_v23  ;;  %2837 = vmatprep.subr.bf16.mxu1 %v5374_v25  ;;  %v5467_v23 = vld [vmem:[#allocation7 + $0xc8] sm:$0xff]  }
 0x157   : > { %v5468_v25 = vld [vmem:[#allocation7 + $0x88] sm:$0xff]  }
 0x158   : > { %2347 = vmatmul.mubr.bf16.gmra.mrb[28].mxu0 %v5368_v24  ;;  %2799 = vmatmul.mubr.bf16.gmra.mrb[28].mxu1 %v5368_v24  ;;  %v5466_v24 = vld [vmem:[#allocation7 + $0x8] sm:$0xff]  }
 0x159   : > { %2386 = vmatpush1.bf16.msra.mxu0 %v5369_v26  ;;  %2838 = vmatpush1.bf16.msra.mxu1 %v5372_v27  ;;  %v5469_v26 = vld [vmem:[#allocation7 + $0x50] sm:$0xff]  }
 0x15a   : > { %2387 = vmatprep.subr.bf16.mxu0 %v5377_v28  ;;  %2839 = vmatprep.subr.bf16.mxu1 %v5380_v29  ;;  %v5471_v27 = vld [vmem:[#allocation7 + $0xd0] sm:$0xff]  }
 0x15b   : > { %2389 = vmatprep.mubr.bf16.mxu0 %v5383_v31  ;;  %2841 = vmatprep.mubr.bf16.mxu1 %v5383_v31  ;;  %v5454_v28 = vld [vmem:[%s5999_s9 + $0x50] ss:$28 sps:$4 sm:$0xff]   ;;  %v5473_v31 = vld [vmem:[#allocation7 + $0x58] sm:$0xff]  }
 0x15c   : > { %v5470_v29 = vld [vmem:[#allocation7 + $0x10] sm:$0xff]  }
 0x15d   : > { %2388 = vmatpush1.bf16.msra.mxu0 %v5375_v30  ;;  %2840 = vmatpush1.bf16.msra.mxu1 %v5378_v32  ;;  %v5472_v30 = vld [vmem:[#allocation7 + $0x90] sm:$0xff]   ;;  %v5475_v32 = vld [vmem:[#allocation7 + $0xd8] sm:$0xff]  }
 0x15e   : > { %2470 = vmatprep.subr.bf16.mxu0 %v5386_v33  ;;  %2922 = vmatprep.subr.bf16.mxu1 %v5389_v35  ;;  %v5474_v33 = vld [vmem:[#allocation7 + $0x18] sm:$0xff]   ;;  %v5477_v35 = vld [vmem:[#allocation7 + $0x60] sm:$0xff]  }
 0x160   : > { %2390 = vmatmul.mubr.bf16.vlgmr.msra.gmra.mrb[0].mxu0 %v5381_v34  ;;  %2842 = vmatmul.mubr.bf16.vlgmr.msra.gmra.mrb[0].mxu1 %v5381_v34  ;;  %v5476_v34 = vld [vmem:[#allocation7 + $0x98] sm:$0xff]  }
 0x161   : > { %2471 = vmatpush1.bf16.msra.mxu0 %v5384_v36  ;;  %2923 = vmatpush1.bf16.msra.mxu1 %v5387_v37  ;;  %v5479_v36 = vld [vmem:[#allocation7 + $0xe0] sm:$0xff]  }
 0x162   : > { %2399 = vmatprep.mubr.bf16.mxu0 %v5390_v38  ;;  %2851 = vmatprep.mubr.bf16.mxu1 %v5390_v38  ;;  %v5455_v37 = vld [vmem:[%s5999_s9 + $0x88] ss:$28 sps:$4 sm:$0xff]  }
 0x163   : > { %2472 = vmatprep.subr.bf16.mxu0 %v5395_v39  ;;  %2924 = vmatprep.subr.bf16.mxu1 %v5398_v41  ;;  %v5478_v38 = vld [vmem:[#allocation7 + $0x20] sm:$0xff]   ;;  %v5483_v41 = vld [vmem:[#allocation7 + $0xe8] sm:$0xff]  }
 0x164   : > { %v5480_v39 = vld [vmem:[#allocation7 + $0xa0] sm:$0xff]  }
 0x165   : > { %2473 = vmatpush1.bf16.msra.mxu0 %v5393_v40  ;;  %2925 = vmatpush1.bf16.msra.mxu1 %v5396_v42  ;;  %v5481_v40 = vld [vmem:[#allocation7 + $0x68] sm:$0xff]  }
 0x166   : > { %2474 = vmatprep.subr.bf16.mxu0 %v5404_v43  ;;  %2926 = vmatprep.subr.bf16.mxu1 %v5407_v45  ;;  %v5482_v42 = vld [vmem:[#allocation7 + $0x28] sm:$0xff]   ;;  %v5487_v45 = vld [vmem:[#allocation7 + $0xf0] sm:$0xff]  }
 0x167   : > { %v5484_v43 = vld [vmem:[#allocation7 + $0xa8] sm:$0xff]  }
 0x168   : > { %2400 = vmatmul.mubr.bf16.gmra.mrb[4].mxu0 %v5392_v44  ;;  %2852 = vmatmul.mubr.bf16.gmra.mrb[4].mxu1 %v5392_v44  ;;  %v5485_v44 = vld [vmem:[#allocation7 + $0x70] sm:$0xff]  }
 0x169   : > { %2409 = vmatprep.mubr.bf16.mxu0 %v5399_v46  ;;  %2861 = vmatprep.mubr.bf16.mxu1 %v5399_v46  ;;  %v5456_v46 = vld [vmem:[%s5999_s9 + $0xc0] ss:$28 sps:$4 sm:$0xff]  }
 0x16a   : > { %2475 = vmatpush1.bf16.msra.mxu0 %v5402_v47  ;;  %2927 = vmatpush1.bf16.msra.mxu1 %v5405_v48  ;;  %v5486_v47 = vld [vmem:[#allocation7 + $0x30] sm:$0xff]  }
 0x16b   : > { %2476 = vmatprep.subr.bf16.mxu0 %v5413_v49  ;;  %2928 = vmatprep.subr.bf16.mxu1 %v5416_v50  ;;  %v5488_v48 = vld [vmem:[#allocation7 + $0xb0] sm:$0xff]  }
 0x16c   : > { %v5457_v49 = vld [vmem:[%s5999_s9 + $0xf8] ss:$28 sps:$4 sm:$0xff]   ;;  %v5458_v50 = vld [vmem:[%s5999_s9 + $0x130] ss:$28 sps:$4 sm:$0xff]  }
 0x16e   : > { %2477 = vmatpush1.bf16.msra.mxu0 %v5411_v51  ;;  %2929 = vmatpush1.bf16.msra.mxu1 %v5414_v52  ;;  %v5459_v51 = vld [vmem:[%s5999_s9 + $0x168] ss:$28 sps:$4 sm:$0xff]   ;;  %v5460_v52 = vld [vmem:[%s5999_s9 + $0x1a0] ss:$28 sps:$4 sm:$0xff]  }
 0x16f   : > { %2478 = vmatprep.subr.bf16.mxu0 %v5422_v54  ;;  %2930 = vmatprep.subr.bf16.mxu1 %v5425_v56  ;;  %v5491_v54 = vld [vmem:[#allocation7 + $0xf8] sm:$0xff]  }
 0x170   : > { %2410 = vmatmul.mubr.bf16.gmra.mrb[8].mxu0 %v5401_v53  ;;  %2862 = vmatmul.mubr.bf16.gmra.mrb[8].mxu1 %v5401_v53  ;;  %v5489_v53 = vld [vmem:[#allocation7 + $0x78] sm:$0xff]  }
 0x171   : > { %2419 = vmatprep.mubr.bf16.mxu0 %v5408_v55  ;;  %2871 = vmatprep.mubr.bf16.mxu1 %v5408_v55  ;;  %v5490_v55 = vld [vmem:[#allocation7 + $0x38] sm:$0xff]  }
 0x172   : > { %2479 = vmatpush1.bf16.msra.mxu0 %v5420_v57  ;;  %2931 = vmatpush1.bf16.msra.mxu1 %v5423_v58  ;;  %v5492_v56 = vld [vmem:[#allocation7 + $0xb8] sm:$0xff]   ;;  %v5493_v57 = vld [vmem:[#allocation8] sm:$0xff]   ;;  %v703_v58 = vlaneseq }
 0x173   : > { %2480 = vmatprep.subr.bf16.mxu0 %v5431_v59  ;;  %2932 = vmatprep.subr.bf16.mxu1 %v5434_v60 }
 0x174   : > { %v704_v59 = vshrl.u32 %v703_v58, 7 }
 0x176   : > { %2481 = vmatpush1.bf16.msra.mxu0 %v5429_v61  ;;  %2933 = vmatpush1.bf16.msra.mxu1 %v5432_v62  ;;  %v705_v60 = vsub.s32 0, %v704_v59  ;;  %v713_v61 = vsub.s32 2, %v704_v59  ;;  %v701_v62 = vld [vmem:[%s6259_s2] sm:$0xf] }
 0x177   : > { %2482 = vmatprep.subr.bf16.mxu0 %v5440_v0  ;;  %2934 = vmatprep.subr.bf16.mxu1 %v5443_v2  ;;  %v717_v0 = vsub.s32 3, %v704_v59 }
 0x178   : > { %2420 = vmatmul.mubr.bf16.gmra.mrb[12].mxu0 %v5410_v63  ;;  %2872 = vmatmul.mubr.bf16.gmra.mrb[12].mxu1 %v5410_v63  ;;  %v709_v63 = vsub.s32 1, %v704_v59  ;;  %v6090_v2 = vrot.slane %v701_v62, %v713_v61 }
 0x179   : > { %2429 = vmatprep.mubr.bf16.mxu0 %v5417_v1  ;;  %2881 = vmatprep.mubr.bf16.mxu1 %v5417_v1  ;;  %v6088_v1 = vrot.slane %v701_v62, %v705_v60 }
 0x17a   : > { %2483 = vmatpush1.bf16.msra.mxu0 %v5438_v3  ;;  %2935 = vmatpush1.bf16.msra.mxu1 %v5441_v4  ;;  %v6092_v3 = vrot.slane %v701_v62, %v709_v63  ;;  %v6094_v4 = vrot.slane %v701_v62, %v717_v0 }
 0x17b   : > { %2484 = vmatprep.subr.bf16.mxu0 %v5449_v5  ;;  %2936 = vmatprep.subr.bf16.mxu1 %v5452_v6 }
 0x17e   : > { %2485 = vmatpush1.bf16.msra.mxu0 %v5447_v7  ;;  %2937 = vmatpush1.bf16.msra.mxu1 %v5450_v8 }
 0x17f   : > { %4466 = vmatprep.subr.bf16.mxu0 %v5461_v9  ;;  %4530 = vmatprep.subr.bf16.mxu1 %v5463_v10 }
 0x180   : > { %2430 = vmatmul.mubr.bf16.gmra.mrb[16].mxu0 %v5419_v11  ;;  %2882 = vmatmul.mubr.bf16.gmra.mrb[16].mxu1 %v5419_v11 }
 0x181   : > { %2439 = vmatprep.mubr.bf16.mxu0 %v5426_v12  ;;  %2891 = vmatprep.mubr.bf16.mxu1 %v5426_v12 }
 0x188   : > { %2440 = vmatmul.mubr.bf16.gmra.mrb[20].mxu0 %v5428_v13  ;;  %2892 = vmatmul.mubr.bf16.gmra.mrb[20].mxu1 %v5428_v13 }
 0x189   : > { %2449 = vmatprep.mubr.bf16.mxu0 %v5435_v14  ;;  %2901 = vmatprep.mubr.bf16.mxu1 %v5435_v14 }
 0x190   : > { %2450 = vmatmul.mubr.bf16.gmra.mrb[24].mxu0 %v5437_v15  ;;  %2902 = vmatmul.mubr.bf16.gmra.mrb[24].mxu1 %v5437_v15 }
 0x191   : > { %2459 = vmatprep.mubr.bf16.mxu0 %v5444_v16  ;;  %2911 = vmatprep.mubr.bf16.mxu1 %v5444_v16 }
 0x198   : > { %2460 = vmatmul.mubr.bf16.gmra.mrb[28].mxu0 %v5446_v17  ;;  %2912 = vmatmul.mubr.bf16.gmra.mrb[28].mxu1 %v5446_v17 }
 0x199   : > { %2502 = vmatprep.mubr.bf16.mxu0 %v5738_v18  ;;  %2954 = vmatprep.mubr.bf16.mxu1 %v5738_v18 }
 0x1a0   : > { %2503 = vmatmul.mubr.bf16.vlgmr.msra.gmra.mrb[0].mxu0 %v5453_v19  ;;  %2955 = vmatmul.mubr.bf16.vlgmr.msra.gmra.mrb[0].mxu1 %v5453_v19 }
 0x1a1   : > { %2512 = vmatprep.mubr.bf16.mxu0 %v5738_v18  ;;  %2964 = vmatprep.mubr.bf16.mxu1 %v5738_v18 }
 0x1a2   : > { %4467 = vmatpush3.bf16.msra.mxu0 %v5462_v20  ;;  %4531 = vmatpush3.bf16.msra.mxu1 %v5464_v21 }
 0x1a3   : > { %4468 = vmatprep.subr.bf16.mxu0 %v5465_v22  ;;  %4532 = vmatprep.subr.bf16.mxu1 %v5467_v23 }
 0x1a6   : > { %4469 = vmatpush3.bf16.msra.mxu0 %v5466_v24  ;;  %4533 = vmatpush3.bf16.msra.mxu1 %v5468_v25 }
 0x1a7   : > { %4470 = vmatprep.subr.bf16.mxu0 %v5469_v26  ;;  %4534 = vmatprep.subr.bf16.mxu1 %v5471_v27 }
 0x1a8   : > { %2513 = vmatmul.mubr.bf16.gmra.mrb[4].mxu0 %v5454_v28  ;;  %2965 = vmatmul.mubr.bf16.gmra.mrb[4].mxu1 %v5454_v28 }
 0x1a9   : > { %2522 = vmatprep.mubr.bf16.mxu0 %v5738_v18  ;;  %2974 = vmatprep.mubr.bf16.mxu1 %v5738_v18 }
 0x1aa   : > { %4471 = vmatpush3.bf16.msra.mxu0 %v5470_v29  ;;  %4535 = vmatpush3.bf16.msra.mxu1 %v5472_v30 }
 0x1ab   : > { %4472 = vmatprep.subr.bf16.mxu0 %v5473_v31  ;;  %4536 = vmatprep.subr.bf16.mxu1 %v5475_v32 }
 0x1ae   : > { %4473 = vmatpush3.bf16.msra.mxu0 %v5474_v33  ;;  %4537 = vmatpush3.bf16.msra.mxu1 %v5476_v34 }
 0x1af   : > { %4474 = vmatprep.subr.bf16.mxu0 %v5477_v35  ;;  %4538 = vmatprep.subr.bf16.mxu1 %v5479_v36 }
 0x1b0   : > { %2523 = vmatmul.mubr.bf16.gmra.mrb[8].mxu0 %v5455_v37  ;;  %2975 = vmatmul.mubr.bf16.gmra.mrb[8].mxu1 %v5455_v37 }
 0x1b1   : > { %2532 = vmatprep.mubr.bf16.mxu0 %v5738_v18  ;;  %2984 = vmatprep.mubr.bf16.mxu1 %v5738_v18 }
 0x1b2   : > { %4475 = vmatpush3.bf16.msra.mxu0 %v5478_v38  ;;  %4539 = vmatpush3.bf16.msra.mxu1 %v5480_v39  ;;  %v5494_v39 = vld [vmem:[#allocation8 + $0x8] sm:$0xff]  }
 0x1b3   : > { %4476 = vmatprep.subr.bf16.mxu0 %v5481_v40  ;;  %4540 = vmatprep.subr.bf16.mxu1 %v5483_v41 }
 0x1b6   : > { %4477 = vmatpush3.bf16.msra.mxu0 %v5482_v42  ;;  %4541 = vmatpush3.bf16.msra.mxu1 %v5484_v43 }
 0x1b7   : > { %4478 = vmatprep.subr.bf16.mxu0 %v5485_v44  ;;  %4542 = vmatprep.subr.bf16.mxu1 %v5487_v45 }
 0x1b8   : > { %2533 = vmatmul.mubr.bf16.gmra.mrb[12].mxu0 %v5456_v46  ;;  %2985 = vmatmul.mubr.bf16.gmra.mrb[12].mxu1 %v5456_v46 }
 0x1b9   : > { %2542 = vmatprep.mubr.bf16.mxu0 %v5738_v18  ;;  %2994 = vmatprep.mubr.bf16.mxu1 %v5738_v18 }
 0x1ba   : > { %4479 = vmatpush3.bf16.msra.mxu0 %v5486_v47  ;;  %4543 = vmatpush3.bf16.msra.mxu1 %v5488_v48 }
 0x1bb   : > { %4480 = vmatprep.subr.bf16.mxu0 %v5489_v53  ;;  %4544 = vmatprep.subr.bf16.mxu1 %v5491_v54  ;;  %v5495_v54 = vld [vmem:[#allocation8 + $0x10] sm:$0xff]  }
 0x1be   : > { %4481 = vmatpush3.bf16.msra.mxu0 %v5490_v55  ;;  %4545 = vmatpush3.bf16.msra.mxu1 %v5492_v56 }
 0x1bf   : > { %4626 = vmatprep.subr.bf16.mxu0 %v5493_v57 }
 0x1c0   : > { %2543 = vmatmul.mubr.bf16.gmra.mrb[16].mxu0 %v5457_v49  ;;  %2995 = vmatmul.mubr.bf16.gmra.mrb[16].mxu1 %v5457_v49 }
 0x1c1   : > { %2552 = vmatprep.mubr.bf16.mxu0 %v5738_v18  ;;  %3004 = vmatprep.mubr.bf16.mxu1 %v5738_v18 }
 0x1c8   : > { %2553 = vmatmul.mubr.bf16.gmra.mrb[20].mxu0 %v5458_v50  ;;  %3005 = vmatmul.mubr.bf16.gmra.mrb[20].mxu1 %v5458_v50 }
 0x1c9   : > { %2562 = vmatprep.mubr.bf16.mxu0 %v5738_v18  ;;  %3014 = vmatprep.mubr.bf16.mxu1 %v5738_v18 }
 0x1d0   : > { %2563 = vmatmul.mubr.bf16.gmra.mrb[24].mxu0 %v5459_v51  ;;  %3015 = vmatmul.mubr.bf16.gmra.mrb[24].mxu1 %v5459_v51 }
 0x1d1   : > { %2572 = vmatprep.mubr.bf16.mxu0 %v5738_v18  ;;  %3024 = vmatprep.mubr.bf16.mxu1 %v5738_v18 }
 0x1d8   : > { %2573 = vmatmul.mubr.bf16.gmra.mrb[28].mxu0 %v5460_v52  ;;  %3025 = vmatmul.mubr.bf16.gmra.mrb[28].mxu1 %v5460_v52 }
 0x273   : > { %v2504_v5 = vpop.f32.mrb[0].mxu0  ;;  %v2956_v6 = vpop.f32.mrb[0].mxu1 }
 0x274   : > { %v4690_v7 = vadd.f32 %v2504_v5, %v6088_v1  ;;  %v4722_v8 = vadd.f32 %v2956_v6, %v6090_v2  ;;  %v2506_v9 = vpop.f32.mrb[1].mxu0  ;;  %v2958_v10 = vpop.f32.mrb[1].mxu1 }
 0x275   : > { %v4691_v11 = vadd.f32 %v2506_v9, %v6092_v3  ;;  %v4723_v12 = vadd.f32 %v2958_v10, %v6094_v4  ;;  %v2508_v13 = vpop.f32.mrb[2].mxu0  ;;  %v2960_v14 = vpop.f32.mrb[2].mxu1 }
 0x276   : > { %v4692_v15 = vadd.f32 %v2508_v13, %v6088_v1  ;;  %v4724_v16 = vadd.f32 %v2960_v14, %v6090_v2  ;;  %v2510_v17 = vpop.f32.mrb[3].mxu0  ;;  %v2962_v18 = vpop.f32.mrb[3].mxu1  ;;  %v3035_v21 = vmax.f32 %v4690_v7, 0.0  ;;  %v3037_v22 = vmax.f32 %v4722_v8, 0.0 }
 0x277   : > { %v4693_v19 = vadd.f32 %v2510_v17, %v6092_v3  ;;  %v4725_v20 = vadd.f32 %v2962_v18, %v6094_v4  ;;  %v3036_v25 = vmax.f32 %v4691_v11, 0.0  ;;  %v3038_v26 = vmax.f32 %v4723_v12, 0.0 }
 0x278   : > { %v3039_v23 = vmax.f32 %v4692_v15, 0.0  ;;  %v3041_v24 = vmax.f32 %v4724_v16, 0.0 }
 0x279   : > { %v3040_v27 = vmax.f32 %v4693_v19, 0.0  ;;  %v3042_v28 = vmax.f32 %v4725_v20, 0.0 }
 0x27a   : > { %v3099_v29 = vpack.c.bf16 %v3039_v23, %v3035_v21  ;;  %v3101_v30 = vpack.c.bf16 %v3041_v24, %v3037_v22 }
 0x27b   : > { %v3100_v31 = vpack.c.bf16 %v3040_v27, %v3036_v25  ;;  %v3102_v32 = vpack.c.bf16 %v3042_v28, %v3038_v26  ;;  %v2514_v33 = vpop.f32.mrb[4].mxu0  ;;  %v2966_v34 = vpop.f32.mrb[4].mxu1 }
 0x27c   : > { %v4694_v35 = vadd.f32 %v2514_v33, %v6088_v1  ;;  %v4726_v36 = vadd.f32 %v2966_v34, %v6090_v2  ;;  %v2516_v37 = vpop.f32.mrb[5].mxu0  ;;  %v2968_v38 = vpop.f32.mrb[5].mxu1 }
 0x27d   : > { %v4695_v40 = vadd.f32 %v2516_v37, %v6092_v3  ;;  %v4727_v41 = vadd.f32 %v2968_v38, %v6094_v4  ;;  %v2518_v42 = vpop.f32.mrb[6].mxu0  ;;  %v2970_v43 = vpop.f32.mrb[6].mxu1  ;;  %3426 = vmatprep.mubr.bf16.mxu0 %v3100_v31  ;;  %3523 = vmatprep.mubr.bf16.mxu1 %v3102_v32 }
 0x27e   : > { %v4696_v44 = vadd.f32 %v2518_v42, %v6088_v1  ;;  %v4728_v45 = vadd.f32 %v2970_v43, %v6090_v2  ;;  %v2520_v46 = vpop.f32.mrb[7].mxu0  ;;  %v2972_v47 = vpop.f32.mrb[7].mxu1  ;;  %3427 = vmatmul.mubr.bf16.vlgmr.msra.gmra.mrb[32].mxu0 %v3099_v29  ;;  %3524 = vmatmul.mubr.bf16.vlgmr.msra.gmra.mrb[32].mxu1 %v3101_v30  ;;  %v3043_v50 = vmax.f32 %v4694_v35, 0.0  ;;  %v3045_v51 = vmax.f32 %v4726_v36, 0.0 }
 0x27f   : > { %v4697_v48 = vadd.f32 %v2520_v46, %v6092_v3  ;;  %v4729_v49 = vadd.f32 %v2972_v47, %v6094_v4  ;;  %4627 = vmatpush3.bf16.msra.mxu0 %v5493_v57  ;;  %v3044_v55 = vmax.f32 %v4695_v40, 0.0  ;;  %v3046_v56 = vmax.f32 %v4727_v41, 0.0 }
 0x280   : > { %v3047_v52 = vmax.f32 %v4696_v44, 0.0  ;;  %v3049_v53 = vmax.f32 %v4728_v45, 0.0  ;;  %4628 = vmatprep.subr.bf16.mxu0 %v5494_v39 }
 0x281   : > { %v3048_v58 = vmax.f32 %v4697_v48, 0.0  ;;  %v3050_v59 = vmax.f32 %v4729_v49, 0.0 }
 0x282   : > { %v3103_v60 = vpack.c.bf16 %v3047_v52, %v3043_v50  ;;  %v3105_v61 = vpack.c.bf16 %v3049_v53, %v3045_v51 }
 0x283   : > { %v3104_v62 = vpack.c.bf16 %v3048_v58, %v3044_v55  ;;  %v3106_v63 = vpack.c.bf16 %v3050_v59, %v3046_v56  ;;  %v2524_v0 = vpop.f32.mrb[8].mxu0  ;;  %v2976_v5 = vpop.f32.mrb[8].mxu1  ;;  %4629 = vmatpush3.bf16.msra.mxu0 %v5494_v39 }
 0x284   : > { %v4698_v6 = vadd.f32 %v2524_v0, %v6088_v1  ;;  %v4730_v57 = vadd.f32 %v2976_v5, %v6090_v2  ;;  %v2526_v7 = vpop.f32.mrb[9].mxu0  ;;  %v2978_v8 = vpop.f32.mrb[9].mxu1  ;;  %4630 = vmatprep.subr.bf16.mxu0 %v5495_v54 }
 0x285   : > { %v4699_v9 = vadd.f32 %v2526_v7, %v6092_v3  ;;  %v4731_v10 = vadd.f32 %v2978_v8, %v6094_v4  ;;  %v2528_v11 = vpop.f32.mrb[10].mxu0  ;;  %v2980_v12 = vpop.f32.mrb[10].mxu1  ;;  %3434 = vmatprep.mubr.bf16.mxu0 %v3104_v62  ;;  %3531 = vmatprep.mubr.bf16.mxu1 %v3106_v63 }
 0x286   : > { %v4700_v13 = vadd.f32 %v2528_v11, %v6088_v1  ;;  %v4732_v14 = vadd.f32 %v2980_v12, %v6090_v2  ;;  %v2530_v15 = vpop.f32.mrb[11].mxu0  ;;  %v2982_v16 = vpop.f32.mrb[11].mxu1  ;;  %3435 = vmatmul.mubr.bf16.gmra.mrb[36].mxu0 %v3103_v60  ;;  %3532 = vmatmul.mubr.bf16.gmra.mrb[36].mxu1 %v3105_v61  ;;  %v3051_v19 = vmax.f32 %v4698_v6, 0.0  ;;  %v3053_v20 = vmax.f32 %v4730_v57, 0.0 }
 0x287   : > { %v4701_v17 = vadd.f32 %v2530_v15, %v6092_v3  ;;  %v4733_v18 = vadd.f32 %v2982_v16, %v6094_v4  ;;  %4631 = vmatpush3.bf16.msra.mxu0 %v5495_v54  ;;  %v3052_v23 = vmax.f32 %v4699_v9, 0.0  ;;  %v3054_v24 = vmax.f32 %v4731_v10, 0.0 }
 0x288   : > { %v3055_v21 = vmax.f32 %v4700_v13, 0.0  ;;  %v3057_v22 = vmax.f32 %v4732_v14, 0.0 }
 0x289   : > { %v3056_v25 = vmax.f32 %v4701_v17, 0.0  ;;  %v3058_v26 = vmax.f32 %v4733_v18, 0.0 }
 0x28a   : > { %v3107_v27 = vpack.c.bf16 %v3055_v21, %v3051_v19  ;;  %v3109_v28 = vpack.c.bf16 %v3057_v22, %v3053_v20 }
 0x28b   : > { %v3108_v29 = vpack.c.bf16 %v3056_v25, %v3052_v23  ;;  %v3110_v30 = vpack.c.bf16 %v3058_v26, %v3054_v24  ;;  %v2534_v31 = vpop.f32.mrb[12].mxu0  ;;  %v2986_v32 = vpop.f32.mrb[12].mxu1 }
 0x28c   : > { %v4702_v33 = vadd.f32 %v2534_v31, %v6088_v1  ;;  %v4734_v34 = vadd.f32 %v2986_v32, %v6090_v2  ;;  %v2536_v35 = vpop.f32.mrb[13].mxu0  ;;  %v2988_v36 = vpop.f32.mrb[13].mxu1 }
 0x28d   : > { %v4703_v37 = vadd.f32 %v2536_v35, %v6092_v3  ;;  %v4735_v38 = vadd.f32 %v2988_v36, %v6094_v4  ;;  %v2538_v39 = vpop.f32.mrb[14].mxu0  ;;  %v2990_v40 = vpop.f32.mrb[14].mxu1  ;;  %3442 = vmatprep.mubr.bf16.mxu0 %v3108_v29  ;;  %3539 = vmatprep.mubr.bf16.mxu1 %v3110_v30 }
 0x28e   : > { %v4704_v41 = vadd.f32 %v2538_v39, %v6088_v1  ;;  %v4736_v42 = vadd.f32 %v2990_v40, %v6090_v2  ;;  %v2540_v43 = vpop.f32.mrb[15].mxu0  ;;  %v2992_v44 = vpop.f32.mrb[15].mxu1  ;;  %3443 = vmatmul.mubr.bf16.gmra.mrb[40].mxu0 %v3107_v27  ;;  %3540 = vmatmul.mubr.bf16.gmra.mrb[40].mxu1 %v3109_v28  ;;  %v3059_v47 = vmax.f32 %v4702_v33, 0.0  ;;  %v3061_v48 = vmax.f32 %v4734_v34, 0.0 }
 0x28f   : > { %v4705_v45 = vadd.f32 %v2540_v43, %v6092_v3  ;;  %v4737_v46 = vadd.f32 %v2992_v44, %v6094_v4  ;;  %v3060_v51 = vmax.f32 %v4703_v37, 0.0  ;;  %v3062_v52 = vmax.f32 %v4735_v38, 0.0 }
 0x290   : > { %v3063_v49 = vmax.f32 %v4704_v41, 0.0  ;;  %v3065_v50 = vmax.f32 %v4736_v42, 0.0 }
 0x291   : > { %v3064_v53 = vmax.f32 %v4705_v45, 0.0  ;;  %v3066_v54 = vmax.f32 %v4737_v46, 0.0 }
 0x292   : > { %v3111_v55 = vpack.c.bf16 %v3063_v49, %v3059_v47  ;;  %v3113_v56 = vpack.c.bf16 %v3065_v50, %v3061_v48 }
 0x293   : > { %v3112_v58 = vpack.c.bf16 %v3064_v53, %v3060_v51  ;;  %v3114_v59 = vpack.c.bf16 %v3066_v54, %v3062_v52  ;;  %v2544_v60 = vpop.f32.mrb[16].mxu0  ;;  %v2996_v61 = vpop.f32.mrb[16].mxu1 }
 0x294   : > { %v4706_v62 = vadd.f32 %v2544_v60, %v6088_v1  ;;  %v4738_v63 = vadd.f32 %v2996_v61, %v6090_v2  ;;  %v2546_v0 = vpop.f32.mrb[17].mxu0  ;;  %v2998_v5 = vpop.f32.mrb[17].mxu1 }
 0x295   : > { %v4707_v6 = vadd.f32 %v2546_v0, %v6092_v3  ;;  %v4739_v57 = vadd.f32 %v2998_v5, %v6094_v4  ;;  %v2548_v7 = vpop.f32.mrb[18].mxu0  ;;  %v3000_v8 = vpop.f32.mrb[18].mxu1  ;;  %3450 = vmatprep.mubr.bf16.mxu0 %v3112_v58  ;;  %3547 = vmatprep.mubr.bf16.mxu1 %v3114_v59 }
 0x296   : > { %v4708_v9 = vadd.f32 %v2548_v7, %v6088_v1  ;;  %v4740_v10 = vadd.f32 %v3000_v8, %v6090_v2  ;;  %v2550_v11 = vpop.f32.mrb[19].mxu0  ;;  %v3002_v12 = vpop.f32.mrb[19].mxu1  ;;  %3451 = vmatmul.mubr.bf16.gmra.mrb[44].mxu0 %v3111_v55  ;;  %3548 = vmatmul.mubr.bf16.gmra.mrb[44].mxu1 %v3113_v56  ;;  %v3067_v15 = vmax.f32 %v4706_v62, 0.0  ;;  %v3069_v16 = vmax.f32 %v4738_v63, 0.0 }
 0x297   : > { %v4709_v13 = vadd.f32 %v2550_v11, %v6092_v3  ;;  %v4741_v14 = vadd.f32 %v3002_v12, %v6094_v4  ;;  %v3068_v19 = vmax.f32 %v4707_v6, 0.0  ;;  %v3070_v20 = vmax.f32 %v4739_v57, 0.0 }
 0x298   : > { %v3071_v17 = vmax.f32 %v4708_v9, 0.0  ;;  %v3073_v18 = vmax.f32 %v4740_v10, 0.0 }
 0x299   : > { %v3072_v21 = vmax.f32 %v4709_v13, 0.0  ;;  %v3074_v22 = vmax.f32 %v4741_v14, 0.0 }
 0x29a   : > { %v3115_v23 = vpack.c.bf16 %v3071_v17, %v3067_v15  ;;  %v3117_v24 = vpack.c.bf16 %v3073_v18, %v3069_v16 }
 0x29b   : > { %v3116_v25 = vpack.c.bf16 %v3072_v21, %v3068_v19  ;;  %v3118_v26 = vpack.c.bf16 %v3074_v22, %v3070_v20  ;;  %v2554_v27 = vpop.f32.mrb[20].mxu0  ;;  %v3006_v28 = vpop.f32.mrb[20].mxu1 }
 0x29c   : > { %v4710_v29 = vadd.f32 %v2554_v27, %v6088_v1  ;;  %v4742_v30 = vadd.f32 %v3006_v28, %v6090_v2  ;;  %v2556_v31 = vpop.f32.mrb[21].mxu0  ;;  %v3008_v32 = vpop.f32.mrb[21].mxu1 }
 0x29d   : > { %v4711_v33 = vadd.f32 %v2556_v31, %v6092_v3  ;;  %v4743_v34 = vadd.f32 %v3008_v32, %v6094_v4  ;;  %v2558_v35 = vpop.f32.mrb[22].mxu0  ;;  %v3010_v36 = vpop.f32.mrb[22].mxu1  ;;  %3458 = vmatprep.mubr.bf16.mxu0 %v3116_v25  ;;  %3555 = vmatprep.mubr.bf16.mxu1 %v3118_v26 }
 0x29e   : > { %v4712_v37 = vadd.f32 %v2558_v35, %v6088_v1  ;;  %v4744_v38 = vadd.f32 %v3010_v36, %v6090_v2  ;;  %v2560_v39 = vpop.f32.mrb[23].mxu0  ;;  %v3012_v40 = vpop.f32.mrb[23].mxu1  ;;  %3459 = vmatmul.mubr.bf16.gmra.mrb[48].mxu0 %v3115_v23  ;;  %3556 = vmatmul.mubr.bf16.gmra.mrb[48].mxu1 %v3117_v24  ;;  %v3075_v43 = vmax.f32 %v4710_v29, 0.0  ;;  %v3077_v44 = vmax.f32 %v4742_v30, 0.0 }
 0x29f   : > { %v4713_v41 = vadd.f32 %v2560_v39, %v6092_v3  ;;  %v4745_v42 = vadd.f32 %v3012_v40, %v6094_v4  ;;  %v3076_v47 = vmax.f32 %v4711_v33, 0.0  ;;  %v3078_v48 = vmax.f32 %v4743_v34, 0.0 }
 0x2a0   : > { %v3079_v45 = vmax.f32 %v4712_v37, 0.0  ;;  %v3081_v46 = vmax.f32 %v4744_v38, 0.0 }
 0x2a1   : > { %v3080_v49 = vmax.f32 %v4713_v41, 0.0  ;;  %v3082_v50 = vmax.f32 %v4745_v42, 0.0 }
 0x2a2   : > { %v3119_v51 = vpack.c.bf16 %v3079_v45, %v3075_v43  ;;  %v3121_v52 = vpack.c.bf16 %v3081_v46, %v3077_v44 }
 0x2a3   : > { %v3120_v53 = vpack.c.bf16 %v3080_v49, %v3076_v47  ;;  %v3122_v54 = vpack.c.bf16 %v3082_v50, %v3078_v48  ;;  %v2564_v55 = vpop.f32.mrb[24].mxu0  ;;  %v3016_v56 = vpop.f32.mrb[24].mxu1  ;;  %v5496_v49 = vld [vmem:[#allocation8 + $0x18] sm:$0xff]   ;;  %v5499_v50 = vld [vmem:[#allocation8 + $0x30] sm:$0xff]  }
 0x2a4   : > { %v4714_v58 = vadd.f32 %v2564_v55, %v6088_v1  ;;  %v4746_v59 = vadd.f32 %v3016_v56, %v6090_v2  ;;  %v2566_v60 = vpop.f32.mrb[25].mxu0  ;;  %v3018_v61 = vpop.f32.mrb[25].mxu1  ;;  %4632 = vmatprep.subr.bf16.mxu0 %v5496_v49  ;;  %v5504_v55 = vld [vmem:[#allocation10 + $0x18] sm:$0xff]   ;;  %v5505_v56 = vld [vmem:[#allocation10 + $0x20] sm:$0xff]  }
 0x2a5   : > { %v4715_v62 = vadd.f32 %v2566_v60, %v6092_v3  ;;  %v4747_v63 = vadd.f32 %v3018_v61, %v6094_v4  ;;  %v2568_v0 = vpop.f32.mrb[26].mxu0  ;;  %v3020_v5 = vpop.f32.mrb[26].mxu1  ;;  %3466 = vmatprep.mubr.bf16.mxu0 %v3120_v53  ;;  %3563 = vmatprep.mubr.bf16.mxu1 %v3122_v54  ;;  %v5502_v53 = vld [vmem:[#allocation10 + $0x8] sm:$0xff]   ;;  %v5503_v54 = vld [vmem:[#allocation10 + $0x10] sm:$0xff]   ;;  %v6163_v61 = vld [vmem:[%s6261_s4] ss:$0 sm:$0xff] }
 0x2a6   : > { %v4716_v6 = vadd.f32 %v2568_v0, %v6088_v1  ;;  %v4748_v57 = vadd.f32 %v3020_v5, %v6090_v2  ;;  %v2570_v7 = vpop.f32.mrb[27].mxu0  ;;  %v3022_v8 = vpop.f32.mrb[27].mxu1  ;;  %3467 = vmatmul.mubr.bf16.gmra.mrb[52].mxu0 %v3119_v51  ;;  %3564 = vmatmul.mubr.bf16.gmra.mrb[52].mxu1 %v3121_v52  ;;  %v3083_v11 = vmax.f32 %v4714_v58, 0.0  ;;  %v3085_v12 = vmax.f32 %v4746_v59, 0.0  ;;  %v5500_v51 = vld [vmem:[#allocation8 + $0x38] sm:$0xff]   ;;  %v5501_v52 = vld [vmem:[#allocation10] sm:$0xff]  }
 0x2a7   : > { %v4717_v9 = vadd.f32 %v2570_v7, %v6092_v3  ;;  %v4749_v10 = vadd.f32 %v3022_v8, %v6094_v4  ;;  %v3084_v15 = vmax.f32 %v4715_v62, 0.0  ;;  %v3086_v16 = vmax.f32 %v4747_v63, 0.0  ;;  %4633 = vmatpush3.bf16.msra.mxu0 %v5496_v49  ;;  %4658 = vmatprep.subr.bf16.mxu1 %v5501_v52  ;;  %v5506_v58 = vld [vmem:[#allocation10 + $0x28] sm:$0xff]  }
 0x2a8   : > { %v3087_v13 = vmax.f32 %v4716_v6, 0.0  ;;  %v3089_v14 = vmax.f32 %v4748_v57, 0.0  ;;  %4659 = vmatpush3.bf16.msra.mxu1 %v5501_v52 }
 0x2a9   : > { %v3088_v17 = vmax.f32 %v4717_v9, 0.0  ;;  %v3090_v18 = vmax.f32 %v4749_v10, 0.0  ;;  %4660 = vmatprep.subr.bf16.mxu1 %v5502_v53 }
 0x2aa   : > { %v3123_v19 = vpack.c.bf16 %v3087_v13, %v3083_v11  ;;  %v3125_v20 = vpack.c.bf16 %v3089_v14, %v3085_v12 }
 0x2ab   : > { %v3124_v21 = vpack.c.bf16 %v3088_v17, %v3084_v15  ;;  %v3126_v22 = vpack.c.bf16 %v3090_v18, %v3086_v16  ;;  %v2574_v23 = vpop.f32.mrb[28].mxu0  ;;  %v3026_v24 = vpop.f32.mrb[28].mxu1 }
 0x2ac   : > { %v4718_v25 = vadd.f32 %v2574_v23, %v6088_v1  ;;  %v4750_v26 = vadd.f32 %v3026_v24, %v6090_v2  ;;  %v2576_v27 = vpop.f32.mrb[29].mxu0  ;;  %v3028_v28 = vpop.f32.mrb[29].mxu1  ;;  %4661 = vmatpush3.bf16.msra.mxu1 %v5502_v53 }
 0x2ad   : > { %v4719_v29 = vadd.f32 %v2576_v27, %v6092_v3  ;;  %v4751_v30 = vadd.f32 %v3028_v28, %v6094_v4  ;;  %v2578_v31 = vpop.f32.mrb[30].mxu0  ;;  %v3030_v32 = vpop.f32.mrb[30].mxu1  ;;  %3474 = vmatprep.mubr.bf16.mxu0 %v3124_v21  ;;  %3571 = vmatprep.mubr.bf16.mxu1 %v3126_v22 }
 0x2ae   : > { %v4720_v33 = vadd.f32 %v2578_v31, %v6088_v1  ;;  %v4752_v34 = vadd.f32 %v3030_v32, %v6090_v2  ;;  %v2580_v35 = vpop.f32.mrb[31].mxu0  ;;  %v3032_v36 = vpop.f32.mrb[31].mxu1  ;;  %3475 = vmatmul.mubr.bf16.gmra.mrb[56].mxu0 %v3123_v19  ;;  %3572 = vmatmul.mubr.bf16.gmra.mrb[56].mxu1 %v3125_v20  ;;  %v3091_v39 = vmax.f32 %v4718_v25, 0.0  ;;  %v3093_v40 = vmax.f32 %v4750_v26, 0.0 }
 0x2af   : > { %v4721_v37 = vadd.f32 %v2580_v35, %v6092_v3  ;;  %v4753_v38 = vadd.f32 %v3032_v36, %v6094_v4  ;;  %v3092_v43 = vmax.f32 %v4719_v29, 0.0  ;;  %v3094_v44 = vmax.f32 %v4751_v30, 0.0  ;;  %v5497_v3 = vld [vmem:[#allocation8 + $0x20] sm:$0xff]   ;;  %v5498_v4 = vld [vmem:[#allocation8 + $0x28] sm:$0xff]   ;;  %4662 = vmatprep.subr.bf16.mxu1 %v5503_v54 }
 0x2b0   : > { %v3095_v41 = vmax.f32 %v4720_v33, 0.0  ;;  %v3097_v42 = vmax.f32 %v4752_v34, 0.0  ;;  %4634 = vmatprep.subr.bf16.mxu0 %v5497_v3  ;;  %4663 = vmatpush3.bf16.msra.mxu1 %v5503_v54 }
 0x2b1   : > { %v3096_v45 = vmax.f32 %v4721_v37, 0.0  ;;  %v3098_v46 = vmax.f32 %v4753_v38, 0.0  ;;  %4635 = vmatpush3.bf16.msra.mxu0 %v5497_v3  ;;  %4664 = vmatprep.subr.bf16.mxu1 %v5504_v55 }
 0x2b2   : > { %v3127_v47 = vpack.c.bf16 %v3095_v41, %v3091_v39  ;;  %v3129_v1 = vpack.c.bf16 %v3097_v42, %v3093_v40  ;;  %4636 = vmatprep.subr.bf16.mxu0 %v5498_v4 }
 0x2b3   : > { %v3128_v48 = vpack.c.bf16 %v3096_v45, %v3092_v43  ;;  %v3130_v2 = vpack.c.bf16 %v3098_v46, %v3094_v44 }
 0x2b4   : > { %4665 = vmatpush3.bf16.msra.mxu1 %v5504_v55 }
 0x2b5   : > { %3482 = vmatprep.mubr.bf16.mxu0 %v3128_v48  ;;  %3579 = vmatprep.mubr.bf16.mxu1 %v3130_v2 }
 0x2b6   : > { %3483 = vmatmul.mubr.bf16.gmra.mrb[60].mxu0 %v3127_v47  ;;  %3580 = vmatmul.mubr.bf16.gmra.mrb[60].mxu1 %v3129_v1 }
 0x2b7   : > { %4637 = vmatpush3.bf16.msra.mxu0 %v5498_v4  ;;  %4666 = vmatprep.subr.bf16.mxu1 %v5505_v56 }
 0x2b8   : > { %4638 = vmatprep.subr.bf16.mxu0 %v5499_v50  ;;  %4667 = vmatpush3.bf16.msra.mxu1 %v5505_v56 }
 0x2b9   : > { %4668 = vmatprep.subr.bf16.mxu1 %v5506_v58 }
 0x2bb   : > { %4639 = vmatpush3.bf16.msra.mxu0 %v5499_v50 }
 0x2bc   : > { %4640 = vmatprep.subr.bf16.mxu0 %v5500_v51  ;;  %4669 = vmatpush3.bf16.msra.mxu1 %v5506_v58 }
 0x2bf   : > { %4641 = vmatpush3.bf16.msra.mxu0 %v5500_v51 }
 0x351   : > { %v4482_v59 = vpop.f32.mrb[32].mxu0  ;;  %v4546_v60 = vpop.f32.mrb[32].mxu1 }
 0x352   : > { %v4483_v62 = vpop.f32.mrb[33].mxu0  ;;  %v4547_v63 = vpop.f32.mrb[33].mxu1 }
 0x353   : > { %v4484_v0 = vadd.f32 %v4483_v62, %v4482_v59  ;;  %v4548_v5 = vadd.f32 %v4547_v63, %v4546_v60  ;;  %v4485_v6 = vpop.f32.mrb[34].mxu0  ;;  %v4549_v57 = vpop.f32.mrb[34].mxu1 }
 0x354   : > { %v4486_v7 = vpop.f32.mrb[35].mxu0  ;;  %v4550_v8 = vpop.f32.mrb[35].mxu1 }
 0x355   : > { %v3429_v9 = vadd.f32 %v4484_v0, %v6163_v61  ;;  %v4487_v10 = vadd.f32 %v4486_v7, %v4485_v6  ;;  %v4551_v11 = vadd.f32 %v4550_v8, %v4549_v57 }
 0x357   : > { %v3526_v12 = vadd.f32 %v4548_v5, %v3429_v9  ;;  %v3432_v13 = vadd.f32 %v4487_v10, %v6163_v61 }
 0x359   : > { %v3529_v14 = vadd.f32 %v4551_v11, %v3432_v13  ;;  %v4488_v15 = vpop.f32.mrb[36].mxu0  ;;  %v4552_v16 = vpop.f32.mrb[36].mxu1  ;;  %v3588_v19 = vmax.f32 %v3526_v12, 0.0 }
 0x35a   : > { %v4489_v17 = vpop.f32.mrb[37].mxu0  ;;  %v4553_v18 = vpop.f32.mrb[37].mxu1 }
 0x35b   : > { %v3589_v20 = vmax.f32 %v3529_v14, 0.0  ;;  %v4490_v21 = vadd.f32 %v4489_v17, %v4488_v15  ;;  %v4554_v22 = vadd.f32 %v4553_v18, %v4552_v16  ;;  %v4491_v23 = vpop.f32.mrb[38].mxu0  ;;  %v4555_v24 = vpop.f32.mrb[38].mxu1 }
 0x35c   : > { %v4492_v25 = vpop.f32.mrb[39].mxu0  ;;  %v4556_v26 = vpop.f32.mrb[39].mxu1 }
 0x35d   : > { %v3437_v27 = vadd.f32 %v4490_v21, %v6163_v61  ;;  %v4493_v28 = vadd.f32 %v4492_v25, %v4491_v23  ;;  %v4557_v29 = vadd.f32 %v4556_v26, %v4555_v24  ;;  %v3604_v30 = vpack.c.bf16 %v3589_v20, %v3588_v19 }
 0x35f   : > { %v3534_v31 = vadd.f32 %v4554_v22, %v3437_v27  ;;  %v3440_v32 = vadd.f32 %v4493_v28, %v6163_v61  ;;  %4642 = vmatprep.mubr.bf16.mxu0 %v3604_v30 }
 0x361   : > { %v3537_v33 = vadd.f32 %v4557_v29, %v3440_v32  ;;  %v4494_v34 = vpop.f32.mrb[40].mxu0  ;;  %v4558_v35 = vpop.f32.mrb[40].mxu1  ;;  %v3590_v38 = vmax.f32 %v3534_v31, 0.0 }
 0x362   : > { %v4495_v36 = vpop.f32.mrb[41].mxu0  ;;  %v4559_v37 = vpop.f32.mrb[41].mxu1 }
 0x363   : > { %v3591_v39 = vmax.f32 %v3537_v33, 0.0  ;;  %v4496_v40 = vadd.f32 %v4495_v36, %v4494_v34  ;;  %v4560_v41 = vadd.f32 %v4559_v37, %v4558_v35  ;;  %v4497_v42 = vpop.f32.mrb[42].mxu0  ;;  %v4561_v43 = vpop.f32.mrb[42].mxu1 }
 0x364   : > { %v4498_v44 = vpop.f32.mrb[43].mxu0  ;;  %v4562_v45 = vpop.f32.mrb[43].mxu1 }
 0x365   : > { %v3605_v46 = vpack.c.bf16 %v3591_v39, %v3590_v38  ;;  %v3445_v47 = vadd.f32 %v4496_v40, %v6163_v61  ;;  %v4499_v1 = vadd.f32 %v4498_v44, %v4497_v42  ;;  %v4563_v48 = vadd.f32 %v4562_v45, %v4561_v43 }
 0x367   : > { %v3542_v2 = vadd.f32 %v4560_v41, %v3445_v47  ;;  %v3448_v49 = vadd.f32 %v4499_v1, %v6163_v61  ;;  %4643 = vmatmul.mubr.bf16.vlgmr.msra.gmra.mrb[64].mxu0 %v3605_v46 }
 0x369   : > { %v3545_v3 = vadd.f32 %v4563_v48, %v3448_v49  ;;  %v4500_v4 = vpop.f32.mrb[44].mxu0  ;;  %v4564_v50 = vpop.f32.mrb[44].mxu1  ;;  %v3592_v53 = vmax.f32 %v3542_v2, 0.0 }
 0x36a   : > { %v4501_v51 = vpop.f32.mrb[45].mxu0  ;;  %v4565_v52 = vpop.f32.mrb[45].mxu1 }
 0x36b   : > { %v3593_v54 = vmax.f32 %v3545_v3, 0.0  ;;  %v4502_v55 = vadd.f32 %v4501_v51, %v4500_v4  ;;  %v4566_v56 = vadd.f32 %v4565_v52, %v4564_v50  ;;  %v4503_v58 = vpop.f32.mrb[46].mxu0  ;;  %v4567_v59 = vpop.f32.mrb[46].mxu1 }
 0x36c   : > { %v4504_v60 = vpop.f32.mrb[47].mxu0  ;;  %v4568_v62 = vpop.f32.mrb[47].mxu1 }
 0x36d   : > { %v3453_v63 = vadd.f32 %v4502_v55, %v6163_v61  ;;  %v4505_v0 = vadd.f32 %v4504_v60, %v4503_v58  ;;  %v4569_v5 = vadd.f32 %v4568_v62, %v4567_v59  ;;  %v3606_v6 = vpack.c.bf16 %v3593_v54, %v3592_v53 }
 0x36f   : > { %v3550_v57 = vadd.f32 %v4566_v56, %v3453_v63  ;;  %v3456_v7 = vadd.f32 %v4505_v0, %v6163_v61  ;;  %4646 = vmatprep.mubr.bf16.mxu0 %v3606_v6 }
 0x371   : > { %v3553_v8 = vadd.f32 %v4569_v5, %v3456_v7  ;;  %v4506_v9 = vpop.f32.mrb[48].mxu0  ;;  %v4570_v10 = vpop.f32.mrb[48].mxu1  ;;  %v3594_v13 = vmax.f32 %v3550_v57, 0.0 }
 0x372   : > { %v4507_v11 = vpop.f32.mrb[49].mxu0  ;;  %v4571_v12 = vpop.f32.mrb[49].mxu1 }
 0x373   : > { %v3595_v14 = vmax.f32 %v3553_v8, 0.0  ;;  %v4508_v15 = vadd.f32 %v4507_v11, %v4506_v9  ;;  %v4572_v16 = vadd.f32 %v4571_v12, %v4570_v10  ;;  %v4509_v17 = vpop.f32.mrb[50].mxu0  ;;  %v4573_v18 = vpop.f32.mrb[50].mxu1 }
 0x374   : > { %v4510_v19 = vpop.f32.mrb[51].mxu0  ;;  %v4574_v20 = vpop.f32.mrb[51].mxu1 }
 0x375   : > { %v3461_v21 = vadd.f32 %v4508_v15, %v6163_v61  ;;  %v4511_v22 = vadd.f32 %v4510_v19, %v4509_v17  ;;  %v4575_v23 = vadd.f32 %v4574_v20, %v4573_v18  ;;  %v3607_v24 = vpack.c.bf16 %v3595_v14, %v3594_v13 }
 0x377   : > { %v3558_v25 = vadd.f32 %v4572_v16, %v3461_v21  ;;  %v3464_v26 = vadd.f32 %v4511_v22, %v6163_v61  ;;  %4647 = vmatmul.mubr.bf16.gmra.mrb[68].mxu0 %v3607_v24 }
 0x379   : > { %v3561_v27 = vadd.f32 %v4575_v23, %v3464_v26  ;;  %v4512_v28 = vpop.f32.mrb[52].mxu0  ;;  %v4576_v29 = vpop.f32.mrb[52].mxu1  ;;  %v3596_v32 = vmax.f32 %v3558_v25, 0.0  ;;  %v5507_v25 = vld [vmem:[#allocation10 + $0x30] sm:$0xff]   ;;  %v5508_v26 = vld [vmem:[#allocation10 + $0x38] sm:$0xff]  }
 0x37a   : > { %v4513_v30 = vpop.f32.mrb[53].mxu0  ;;  %v4577_v31 = vpop.f32.mrb[53].mxu1  ;;  %4670 = vmatprep.subr.bf16.mxu1 %v5507_v25 }
 0x37b   : > { %v3597_v33 = vmax.f32 %v3561_v27, 0.0  ;;  %v4514_v34 = vadd.f32 %v4513_v30, %v4512_v28  ;;  %v4578_v35 = vadd.f32 %v4577_v31, %v4576_v29  ;;  %v4515_v36 = vpop.f32.mrb[54].mxu0  ;;  %v4579_v37 = vpop.f32.mrb[54].mxu1  ;;  %4671 = vmatpush3.bf16.msra.mxu1 %v5507_v25  ;;  %v4442_v27 = vld [vmem:[%s6263_s6] ss:$0 sm:$0xff] }
 0x37c   : > { %v4516_v38 = vpop.f32.mrb[55].mxu0  ;;  %v4580_v39 = vpop.f32.mrb[55].mxu1  ;;  %4672 = vmatprep.subr.bf16.mxu1 %v5508_v26 }
 0x37d   : > { %v3469_v40 = vadd.f32 %v4514_v34, %v6163_v61  ;;  %v4517_v41 = vadd.f32 %v4516_v38, %v4515_v36  ;;  %v4581_v42 = vadd.f32 %v4580_v39, %v4579_v37  ;;  %v3608_v43 = vpack.c.bf16 %v3597_v33, %v3596_v32 }
 0x37f   : > { %v3566_v44 = vadd.f32 %v4578_v35, %v3469_v40  ;;  %v3472_v45 = vadd.f32 %v4517_v41, %v6163_v61  ;;  %4650 = vmatprep.mubr.bf16.mxu0 %v3608_v43  ;;  %4673 = vmatpush3.bf16.msra.mxu1 %v5508_v26 }
 0x381   : > { %v3569_v46 = vadd.f32 %v4581_v42, %v3472_v45  ;;  %v4518_v47 = vpop.f32.mrb[56].mxu0  ;;  %v4582_v1 = vpop.f32.mrb[56].mxu1  ;;  %v3598_v49 = vmax.f32 %v3566_v44, 0.0 }
 0x382   : > { %v4519_v48 = vpop.f32.mrb[57].mxu0  ;;  %v4583_v2 = vpop.f32.mrb[57].mxu1 }
 0x383   : > { %v3599_v3 = vmax.f32 %v3569_v46, 0.0  ;;  %v4520_v4 = vadd.f32 %v4519_v48, %v4518_v47  ;;  %v4584_v50 = vadd.f32 %v4583_v2, %v4582_v1  ;;  %v4521_v51 = vpop.f32.mrb[58].mxu0  ;;  %v4585_v52 = vpop.f32.mrb[58].mxu1 }
 0x384   : > { %v4522_v53 = vpop.f32.mrb[59].mxu0  ;;  %v4586_v54 = vpop.f32.mrb[59].mxu1 }
 0x385   : > { %v3477_v55 = vadd.f32 %v4520_v4, %v6163_v61  ;;  %v4523_v56 = vadd.f32 %v4522_v53, %v4521_v51  ;;  %v4587_v58 = vadd.f32 %v4586_v54, %v4585_v52  ;;  %v3609_v59 = vpack.c.bf16 %v3599_v3, %v3598_v49 }
 0x387   : > { %v3574_v60 = vadd.f32 %v4584_v50, %v3477_v55  ;;  %v3480_v62 = vadd.f32 %v4523_v56, %v6163_v61  ;;  %4651 = vmatmul.mubr.bf16.gmra.mrb[72].mxu0 %v3609_v59 }
 0x389   : > { %v3577_v63 = vadd.f32 %v4587_v58, %v3480_v62  ;;  %v4524_v0 = vpop.f32.mrb[60].mxu0  ;;  %v4588_v5 = vpop.f32.mrb[60].mxu1  ;;  %v3600_v7 = vmax.f32 %v3574_v60, 0.0 }
 0x38a   : > { %v4525_v6 = vpop.f32.mrb[61].mxu0  ;;  %v4589_v57 = vpop.f32.mrb[61].mxu1 }
 0x38b   : > { %v3601_v8 = vmax.f32 %v3577_v63, 0.0  ;;  %v4526_v9 = vadd.f32 %v4525_v6, %v4524_v0  ;;  %v4590_v10 = vadd.f32 %v4589_v57, %v4588_v5  ;;  %v4527_v11 = vpop.f32.mrb[62].mxu0  ;;  %v4591_v12 = vpop.f32.mrb[62].mxu1 }
 0x38c   : > { %v4528_v13 = vpop.f32.mrb[63].mxu0  ;;  %v4592_v14 = vpop.f32.mrb[63].mxu1 }
 0x38d   : > { %v3485_v15 = vadd.f32 %v4526_v9, %v6163_v61  ;;  %v4529_v16 = vadd.f32 %v4528_v13, %v4527_v11  ;;  %v4593_v17 = vadd.f32 %v4592_v14, %v4591_v12  ;;  %v3610_v18 = vpack.c.bf16 %v3601_v8, %v3600_v7 }
 0x38f   : > { %v3582_v19 = vadd.f32 %v4590_v10, %v3485_v15  ;;  %v3488_v20 = vadd.f32 %v4529_v16, %v6163_v61  ;;  %4654 = vmatprep.mubr.bf16.mxu0 %v3610_v18 }
 0x391   : > { %v3585_v21 = vadd.f32 %v4593_v17, %v3488_v20  ;;  %v3602_v22 = vmax.f32 %v3582_v19, 0.0  ;;  %v4451_v20 = vld [vmem:[%s6291_s29] ss:$0 sm:$0xff] }
 0x393   : > { %v3603_v23 = vmax.f32 %v3585_v21, 0.0 }
 0x395   : > { %v3611_v24 = vpack.c.bf16 %v3603_v23, %v3602_v22 }
 0x397   : > { %4655 = vmatmul.mubr.bf16.gmra.mrb[76].mxu0 %v3611_v24 }
 0x43a   : > { %v4644_v28 = vpop.f32.mrb[64].mxu0 }
 0x43b   : > { %v3726_v29 = vadd.f32 %v4644_v28, %v4442_v27  ;;  %v3717_v30 = vpop.f32.mrb[65].mxu0 }
 0x43c   : > { %v3718_v61 = vadd.f32 %v4442_v27, %v3717_v30  ;;  %v4645_v31 = vpop.f32.mrb[66].mxu0 }
 0x43d   : > { %v3729_v32 = vadd.f32 %v4645_v31, %v4442_v27  ;;  %v3720_v33 = vpop.f32.mrb[67].mxu0  ;;  %v3782_v35 = vmax.f32 %v3726_v29, 0.0 }
 0x43e   : > { %v3721_v34 = vadd.f32 %v4442_v27, %v3720_v33  ;;  %v3780_v37 = vmax.f32 %v3718_v61, 0.0 }
 0x43f   : > { %v3783_v36 = vmax.f32 %v3729_v32, 0.0 }
 0x440   : > { %v3781_v38 = vmax.f32 %v3721_v34, 0.0 }
 0x441   : > { %v3797_v39 = vpack.c.bf16 %v3783_v36, %v3782_v35 }
 0x442   : > { %v3796_v40 = vpack.c.bf16 %v3781_v38, %v3780_v37 }
 0x444   : > { %4674 = vmatprep.mubr.bf16.mxu1 %v3796_v40 }
 0x445   : > { %4675 = vmatmul.mubr.bf16.vlgmr.msra.gmra.mrb[64].mxu1 %v3797_v39 }
 0x44a   : > { %v4648_v41 = vpop.f32.mrb[68].mxu0 }
 0x44b   : > { %v3742_v42 = vadd.f32 %v4648_v41, %v4442_v27  ;;  %v3733_v43 = vpop.f32.mrb[69].mxu0 }
 0x44c   : > { %v3734_v44 = vadd.f32 %v4442_v27, %v3733_v43  ;;  %v4649_v45 = vpop.f32.mrb[70].mxu0 }
 0x44d   : > { %v3745_v46 = vadd.f32 %v4649_v45, %v4442_v27  ;;  %v3736_v47 = vpop.f32.mrb[71].mxu0  ;;  %v3786_v48 = vmax.f32 %v3742_v42, 0.0 }
 0x44e   : > { %v3737_v1 = vadd.f32 %v4442_v27, %v3736_v47  ;;  %v3784_v49 = vmax.f32 %v3734_v44, 0.0 }
 0x44f   : > { %v3787_v2 = vmax.f32 %v3745_v46, 0.0 }
 0x450   : > { %v3785_v3 = vmax.f32 %v3737_v1, 0.0 }
 0x451   : > { %v3799_v4 = vpack.c.bf16 %v3787_v2, %v3786_v48 }
 0x452   : > { %v3798_v50 = vpack.c.bf16 %v3785_v3, %v3784_v49 }
 0x454   : > { %4678 = vmatprep.mubr.bf16.mxu1 %v3798_v50 }
 0x455   : > { %4679 = vmatmul.mubr.bf16.gmra.mrb[68].mxu1 %v3799_v4 }
 0x45a   : > { %v4652_v51 = vpop.f32.mrb[72].mxu0 }
 0x45b   : > { %v3758_v52 = vadd.f32 %v4652_v51, %v4442_v27  ;;  %v3749_v53 = vpop.f32.mrb[73].mxu0 }
 0x45c   : > { %v3750_v54 = vadd.f32 %v4442_v27, %v3749_v53  ;;  %v4653_v55 = vpop.f32.mrb[74].mxu0 }
 0x45d   : > { %v3761_v56 = vadd.f32 %v4653_v55, %v4442_v27  ;;  %v3752_v58 = vpop.f32.mrb[75].mxu0  ;;  %v3790_v60 = vmax.f32 %v3758_v52, 0.0 }
 0x45e   : > { %v3753_v59 = vadd.f32 %v4442_v27, %v3752_v58  ;;  %v3788_v63 = vmax.f32 %v3750_v54, 0.0 }
 0x45f   : > { %v3791_v62 = vmax.f32 %v3761_v56, 0.0 }
 0x460   : > { %v3789_v0 = vmax.f32 %v3753_v59, 0.0 }
 0x461   : > { %v3801_v5 = vpack.c.bf16 %v3791_v62, %v3790_v60 }
 0x462   : > { %v3800_v6 = vpack.c.bf16 %v3789_v0, %v3788_v63 }
 0x464   : > { %4682 = vmatprep.mubr.bf16.mxu1 %v3800_v6 }
 0x465   : > { %4683 = vmatmul.mubr.bf16.gmra.mrb[72].mxu1 %v3801_v5 }
 0x46a   : > { %v4656_v57 = vpop.f32.mrb[76].mxu0 }
 0x46b   : > { %v3774_v7 = vadd.f32 %v4656_v57, %v4442_v27  ;;  %v3765_v8 = vpop.f32.mrb[77].mxu0 }
 0x46c   : > { %v3766_v9 = vadd.f32 %v4442_v27, %v3765_v8  ;;  %v4657_v10 = vpop.f32.mrb[78].mxu0 }
 0x46d   : > { %v3777_v11 = vadd.f32 %v4657_v10, %v4442_v27  ;;  %v3768_v12 = vpop.f32.mrb[79].mxu0  ;;  %v3794_v14 = vmax.f32 %v3774_v7, 0.0 }
 0x46e   : > { %v3769_v13 = vadd.f32 %v4442_v27, %v3768_v12  ;;  %v3792_v16 = vmax.f32 %v3766_v9, 0.0 }
 0x46f   : > { %v3795_v15 = vmax.f32 %v3777_v11, 0.0 }
 0x470   : > { %v3793_v17 = vmax.f32 %v3769_v13, 0.0 }
 0x471   : > { %v3803_v18 = vpack.c.bf16 %v3795_v15, %v3794_v14 }
 0x472   : > { %v3802_v19 = vpack.c.bf16 %v3793_v17, %v3792_v16 }
 0x474   : > { %4686 = vmatprep.mubr.bf16.mxu1 %v3802_v19 }
 0x475   : > { %4687 = vmatmul.mubr.bf16.gmra.mrb[76].mxu1 %v3803_v18 }
 0x518   : > { %v4676_v21 = vpop.f32.mrb[64].mxu1 }
 0x519   : > { %v3918_v22 = vadd.f32 %v4676_v21, %v4451_v20  ;;  %v3909_v23 = vpop.f32.mrb[65].mxu1 }
 0x51a   : > { %v3910_v24 = vadd.f32 %v4451_v20, %v3909_v23  ;;  %v4677_v25 = vpop.f32.mrb[66].mxu1 }
 0x51b   : > { %3974 = vst [vmem:[%s6188_s18 + $0x10] sm:$0xff] %v3918_v22  ;;  %v3921_v26 = vadd.f32 %v4677_v25, %v4451_v20  ;;  %v3912_v27 = vpop.f32.mrb[67].mxu1 }
 0x51c   : > { %3972 = vst [vmem:[%s6188_s18] sm:$0xff] %v3910_v24  ;;  %v3913_v28 = vadd.f32 %v4451_v20, %v3912_v27 }
 0x51d   : > { %3975 = vst [vmem:[%s6188_s18 + $0x18] sm:$0xff] %v3921_v26 }
 0x51e   : > { %3973 = vst [vmem:[%s6188_s18 + $0x8] sm:$0xff] %v3913_v28 }
 0x528   : > { %v4680_v29 = vpop.f32.mrb[68].mxu1 }
 0x529   : > { %v3934_v30 = vadd.f32 %v4680_v29, %v4451_v20  ;;  %v3925_v61 = vpop.f32.mrb[69].mxu1 }
 0x52a   : > { %v3926_v31 = vadd.f32 %v4451_v20, %v3925_v61  ;;  %v4681_v32 = vpop.f32.mrb[70].mxu1 }
 0x52b   : > { %3978 = vst [vmem:[%s6188_s18 + $0x30] sm:$0xff] %v3934_v30  ;;  %v3937_v33 = vadd.f32 %v4681_v32, %v4451_v20  ;;  %v3928_v34 = vpop.f32.mrb[71].mxu1 }
 0x52c   : > { %3976 = vst [vmem:[%s6188_s18 + $0x20] sm:$0xff] %v3926_v31  ;;  %v3929_v35 = vadd.f32 %v4451_v20, %v3928_v34 }
 0x52d   : > { %3979 = vst [vmem:[%s6188_s18 + $0x38] sm:$0xff] %v3937_v33 }
 0x52e   : > { %3977 = vst [vmem:[%s6188_s18 + $0x28] sm:$0xff] %v3929_v35 }
 0x538   : > { %v4684_v36 = vpop.f32.mrb[72].mxu1 }
 0x539   : > { %v3950_v37 = vadd.f32 %v4684_v36, %v4451_v20  ;;  %v3941_v38 = vpop.f32.mrb[73].mxu1 }
 0x53a   : > { %v3942_v39 = vadd.f32 %v4451_v20, %v3941_v38  ;;  %v4685_v40 = vpop.f32.mrb[74].mxu1 }
 0x53b   : > { %3982 = vst [vmem:[%s6188_s18 + $0x50] sm:$0xff] %v3950_v37  ;;  %v3953_v41 = vadd.f32 %v4685_v40, %v4451_v20  ;;  %v3944_v42 = vpop.f32.mrb[75].mxu1 }
 0x53c   : > { %3980 = vst [vmem:[%s6188_s18 + $0x40] sm:$0xff] %v3942_v39  ;;  %v3945_v43 = vadd.f32 %v4451_v20, %v3944_v42 }
 0x53d   : > { %3983 = vst [vmem:[%s6188_s18 + $0x58] sm:$0xff] %v3953_v41 }
 0x53e   : > { %3981 = vst [vmem:[%s6188_s18 + $0x48] sm:$0xff] %v3945_v43 }
 0x548   : > { %v4688_v44 = vpop.f32.mrb[76].mxu1 }
 0x549   : > { %v3966_v45 = vadd.f32 %v4688_v44, %v4451_v20  ;;  %v3957_v46 = vpop.f32.mrb[77].mxu1 }
 0x54a   : > { %v3958_v47 = vadd.f32 %v4451_v20, %v3957_v46  ;;  %v4689_v1 = vpop.f32.mrb[78].mxu1 }
 0x54b   : > { %3986 = vst [vmem:[%s6188_s18 + $0x70] sm:$0xff] %v3966_v45  ;;  %v3969_v48 = vadd.f32 %v4689_v1, %v4451_v20  ;;  %v3960_v2 = vpop.f32.mrb[79].mxu1 }
 0x54c   : > { %3984 = vst [vmem:[%s6188_s18 + $0x60] sm:$0xff] %v3958_v47  ;;  %v3961_v49 = vadd.f32 %v4451_v20, %v3960_v2 }
 0x54d   : > { %3987 = vst [vmem:[%s6188_s18 + $0x78] sm:$0xff] %v3969_v48 }
 0x54e   : > { %3985 = vst [vmem:[%s6188_s18 + $0x68] sm:$0xff] %v3961_v49 }
 0x54f   : > { %5664 = shalt.err (!%p5661_p13)
}
 0x550   : > { %s5665_s23 = scalar_lea.hbm %s6208_s17, 2048  ;;  %s5669_s29 = scalar_lea.hbm %s6292_s15, 4096 }
 0x551   : > { %p5666_p0 = scmp.ne.s32.totalorder %s6208_s17, %s5665_s23  ;;  %p5670_p1 = scmp.lt.u32.totalorder %s6208_s17, %s6292_s15 }
 0x552   : > { %p5671_p2 = scmp.lt.u32.totalorder %s5669_s29, %s5665_s23  ;;  %p5673_p8 = scmp.lt.u32.totalorder %s5665_s23, %s6208_s17 }
 0x553   : > { %p5667_p5 = pnand %p5666_p0, %p5943_p6 }
 0x554   : > { %p5672_p4 = por %p5671_p2, %p5670_p1 }
 0x555   : > { %p5668_p11 = pneg %p5667_p5 }
 0x556   : > { %p5674_p10 = por %p5673_p8, %p5672_p4 }
 0x558   : > { %p5675_p12 = pnand %p5674_p10, %p5668_p11 }
 0x55a   : > { %5678 = shalt.err (!%p5675_p12)
}
 0x55b   : > { %s5740_s30 = smov 128   ;;  %s5741_s9 = smov 8  }
 0x55c   : > { %4967 = dma.vmem_to_hbm [thread:$0]  (%p5943_p6), %s6210_s19, 2048, %s6208_s17, %s3989_s13, %s5740_s30, %s5740_s30, %s5741_s9  }
 0x55d PF: > { %s6293_s21 = sld [smem:[#allocation16_spill]]  ;;  %s6294_s26 = sld [smem:[#allocation17_spill]] }
 0x55e   : > { %p6296_p7 = scmp.ge.s32.totalorder %s5725_s12, 2 }
 0x563   : > { %s4017_s14 = sand.u32 1, %s6293_s21   ;;  %p6295_p3 = scmp.ne.s32.totalorder %s6294_s26, 0 }
 0x564   : > { %s4018_s27 = scalar_lea.sflag [#allocation4], %s4017_s14 }
 0x565   : > { %p4987_p9 = pnand %p6296_p7, %p6295_p3 }
 0x567   : > { %5708 = dma.done.wait (!%p4987_p9), %s4018_s27, 2048  }
 0x568   : > { %5710 = vsyncadd (!%p4987_p9), %s4018_s27, 4294965248  ;;  %p24_p13 = scmp.ge.s32.totalorder %s5933_s28, 4   ;;  %s6297_s30 = smov %s5717_s10 }
 0x569   : > { %s6298_s10 = smov %s5721_s11  ;;  %s6299_s11 = smov %s5949_s16 }
 0x56a   : > { %s6300_s12 = smov %s5933_s28  ;;  %26 = sbr.rel (!%p24_p13) target bundleno = 10 (0xa), region = 117 }
 0x571   :  { %4023 = vsyncpa [#allocation3], 1 }
 0x572   :  { %4025 = vsyncpa [#allocation3 + $0x1], 1 }
 0x573   :  { %4026 = vsyncpa [#allocation6], 1 }
 0x574   :  { %4027 = vsyncpa [#allocation9], 1 }
 0x575   :  { %4028 = vsyncpa [#allocation4], 1 }
 0x576   :  { %4030 = vsyncpa [#allocation4 + $0x1], 1 }

</bundles_post_ra>
